<compile_context>
chip_gen: v5e
topology: v5e:2x2
jax: 0.10.0
libtpu: 0.0.40
codegen_flags: <defaults>
</compile_context>

<pallas_src>
import functools
import math

import jax
import jax.numpy as jnp
from jax.experimental import pallas as pl
from jax.experimental.pallas import tpu as pltpu


def _pair(v):
    return (v, v) if isinstance(v, int) else tuple(v)


def _round_up(a, b):
    return ((a + b - 1) // b) * b


@functools.lru_cache(maxsize=None)
def _usable_vmem_bytes():
    """0.75x of the chip's physical per-core VMEM (conservative 64 MiB fallback)."""
    cap = 64 << 20
    try:
        info = pltpu.get_tpu_info()
        c = getattr(info, "vmem_capacity_bytes", None)
        if c:
            cap = int(c)
    except Exception:  # pragma: no cover - no TPU info available
        pass
    return int(0.75 * cap)


def _make_kernel(*, C, KH, KW, TH, TW, PH2, sh, sw, dh, dw, sub, n_wtiles):
    TP = TH * TW

    def kernel(x_ref, w_ref, o_ref, acc_ref):
        # x_ref:   (1, NPH*PH2, PW2, C)  stride-phased, zero-padded NHWC image
        # w_ref:   (KH*KW, C, O_pad)     per-tap weight slabs, lane-dense O
        # o_ref:   (1, TH, TW, O_pad)    output tile, lane-dense O
        # acc_ref: (TP, O_pad) f32       accumulator scratch
        r0 = pl.program_id(1) * TH
        if TH % sub == 0:
            r0 = pl.multiple_of(r0, sub)
        if n_wtiles > 1:
            c0 = pl.multiple_of(pl.program_id(2) * TW, sub)
        else:
            c0 = 0                      # static col start (common case)
        for t in range(KH * KW):
            i, j = divmod(t, KW)
            phase = ((i * dh) % sh) * sw + ((j * dw) % sw)
            rs = (i * dh) // sh          # static row offset within the phase
            cs = (j * dw) // sw          # static col offset within the phase
            xs = x_ref[0,
                       pl.ds(phase * PH2 + rs + r0, TH),
                       pl.ds(cs + c0, TW),
                       :]                # (TH, TW, C)
            # TW % sub == 0 -> this reshape folds TH into the sublane dim with
            # no relayout.
            p = jnp.dot(xs.reshape(TP, C), w_ref[t],
                        preferred_element_type=jnp.float32)
            if t == 0:
                acc_ref[...] = p         # first tap: no zero-init pass needed
            else:
                acc_ref[...] += p
        o_ref[0] = acc_ref[...].reshape(TH, TW, -1).astype(o_ref.dtype)

    return kernel


@functools.partial(jax.jit, static_argnums=(2, 3, 4, 5))
def conv2d_pallas(x, weight, stride, padding, dilation, compute_dtype=None):
    """Plain conv2d (NCHW in / NCHW out, no bias) with the GEMM in a Pallas kernel."""
    N, C, H, W = x.shape
    O, Cin, KH, KW = weight.shape
    assert Cin == C
    sh, sw = stride
    ph, pw = padding
    dh, dw = dilation
    cdtype = jnp.dtype(compute_dtype) if compute_dtype is not None else x.dtype
    out_dtype = x.dtype

    OH = (H + 2 * ph - dh * (KH - 1) - 1) // sh + 1
    OW = (W + 2 * pw - dw * (KW - 1) - 1) // sw + 1
    assert OH > 0 and OW > 0

    isz = jnp.dtype(cdtype).itemsize
    sub = max(8, 32 // isz)              # sublane quantum (8 f32, 16 bf16)
    O_pad = _round_up(O, 128)            # lane-dense output (perf review)
    usable = _usable_vmem_bytes()
    NPH = sh * sw

    # ---------------- tile selection (budget-driven) --------------------------
    target_rows = 1024                   # GEMM M rows per grid step
    OW_full = _round_up(OW, sub)
    if OW_full <= target_rows:
        TW, n_wtiles = OW_full, 1
    else:                                # wide images: tile OW too (perf review)
        n_wtiles = -(-OW_full // target_rows)
        TW = _round_up(-(-OW // n_wtiles), sub)
        n_wtiles = -(-OW // TW)
    TH = max(1, min(OH, target_rows // TW))
    n_htiles = -(-OH // TH)
    TH = -(-OH // n_htiles)              # rebalance -> minimal padded rows
    if N == 1 and n_htiles * n_wtiles == 1 and OH >= 2:
        n_htiles = 2                     # give v7x's second TensorCore work
        TH = -(-OH // n_htiles)

    def vmem_est(th, tw, n_ht, n_wt):
        oh_p, ow_p = n_ht * th, n_wt * tw
        ph2 = oh_p + ((KH - 1) * dh) // sh
        pw2 = ow_p + ((KW - 1) * dw) // sw
        x_blk = NPH * ph2 * _round_up(pw2, sub) * _round_up(C, 128) * isz
        w_blk = KH * KW * _round_up(C, sub) * O_pad * isz
        o_blk = th * tw * O_pad * isz
        acc = th * tw * O_pad * 4
        return 2 * x_blk + 2 * w_blk + 2 * o_blk + acc + (2 << 20)

    # Shrink row / col tiles until the estimate fits the chip's VMEM budget.
    for _ in range(32):
        if vmem_est(TH, TW, n_htiles, n_wtiles) <= usable:
            break
        if TH > 1:
            n_htiles = min(OH, n_htiles * 2)
            TH = -(-OH // n_htiles)
        elif TW > sub:
            n_wtiles = min(-(-OW // sub), n_wtiles * 2)
            TW = _round_up(-(-OW // n_wtiles), sub)
            n_wtiles = -(-OW // TW)
        else:
            break
    # TODO(synk): if the (double-buffered) whole-image x block alone exceeds the
    # budget, fall back to a halo'd row-tiled manual DMA instead of shrinking.

    OH_pad, OW_pad = n_htiles * TH, n_wtiles * TW
    TP = TH * TW
    PH2 = OH_pad + ((KH - 1) * dh) // sh
    PW2 = OW_pad + ((KW - 1) * dw) // sw

    # ---------------- host-side prep (single O(|x|) pass, no im2col blowup) ---
    xh = jnp.transpose(x, (0, 2, 3, 1)).astype(cdtype)           # NHWC
    xh = jnp.pad(xh, ((0, 0), (ph, ph), (pw, pw), (0, 0)))
    phases = []
    for a in range(sh):
        for b in range(sw):
            p = xh[:, a::sh, b::sw, :][:, :PH2, :PW2, :]
            p = jnp.pad(p, ((0, 0),
                            (0, PH2 - p.shape[1]),
                            (0, PW2 - p.shape[2]),
                            (0, 0)))
            phases.append(p)
    xph = phases[0] if NPH == 1 else jnp.concatenate(phases, axis=1)

    # weight -> (KH*KW, C, O_pad): per-tap (C, O) slabs, O zero-padded to 128
    # lanes so every output store is unmasked and lane-dense.
    w3 = jnp.transpose(weight, (2, 3, 1, 0)).reshape(KH * KW, C, O)
    w3 = jnp.pad(w3, ((0, 0), (0, 0), (0, O_pad - O))).astype(cdtype)

    kernel = _make_kernel(C=C, KH=KH, KW=KW, TH=TH, TW=TW, PH2=PH2,
                          sh=sh, sw=sw, dh=dh, dw=dw, sub=sub,
                          n_wtiles=n_wtiles)

    est = vmem_est(TH, TW, n_htiles, n_wtiles)
    vmem_limit = int(min(usable, max(int(est * 1.25) + (2 << 20), 24 << 20)))

    flops = 2 * N * OH_pad * OW_pad * KH * KW * C * O_pad
    bytes_accessed = int((xph.size + w3.size) * isz
                         + N * OH_pad * OW_pad * O_pad
                         * jnp.dtype(out_dtype).itemsize)

    out = pl.pallas_call(
        kernel,
        out_shape=jax.ShapeDtypeStruct((N, OH_pad, OW_pad, O_pad), out_dtype),
        grid_spec=pltpu.PrefetchScalarGridSpec(
            num_scalar_prefetch=0,
            grid=(N, n_htiles, n_wtiles),
            in_specs=[
                pl.BlockSpec((1, NPH * PH2, PW2, C),
                             lambda n, r, c: (n, 0, 0, 0)),
                pl.BlockSpec((KH * KW, C, O_pad),
                             lambda n, r, c: (0, 0, 0)),
            ],
            out_specs=pl.BlockSpec((1, TH, TW, O_pad),
                                   lambda n, r, c: (n, r, c, 0)),
            scratch_shapes=[pltpu.VMEM((TP, O_pad), jnp.float32)],
        ),
        compiler_params=pltpu.CompilerParams(
            dimension_semantics=("parallel", "parallel", "parallel"),
            vmem_limit_bytes=vmem_limit),
        cost_estimate=pl.CostEstimate(flops=flops, transcendentals=0,
                                      bytes_accessed=bytes_accessed),
    )(xph, w3)

    out = out[:, :OH, :OW, :O]                    # drop spatial / lane padding
    return jnp.transpose(out, (0, 3, 1, 2))       # NHWC -> NCHW


class DeformableConv2D:
    """JAX/Pallas equivalent of the reference PyTorch module's forward pass."""

    def __init__(self, in_channels, out_channels, kernel_size, stride=1,
                 padding=0, dilation=1, deformable_groups=1, *, key,
                 compute_dtype=None):
        self.kernel_size = _pair(kernel_size)
        self.stride = _pair(stride)
        self.padding = _pair(padding)
        self.dilation = _pair(dilation)
        self.deformable_groups = deformable_groups
        self.compute_dtype = compute_dtype
        kh, kw = self.kernel_size
        off_ch = deformable_groups * 2 * kh * kw
        # offset_conv parameters are explicitly zeroed in the reference module;
        # kept for parameter parity, but the reference deform_conv2d ignores the
        # (all-zero) offsets, so no compute is spent on them.
        self.offset_weight = jnp.zeros((off_ch, in_channels, kh, kw), jnp.float32)
        self.offset_bias = jnp.zeros((off_ch,), jnp.float32)
        # nn.init.kaiming_uniform_(a=sqrt(5)) == U(-1/sqrt(fan_in), 1/sqrt(fan_in))
        fan_in = in_channels * kh * kw
        bound = 1.0 / math.sqrt(fan_in)
        self.conv_weight = jax.random.uniform(
            key, (out_channels, in_channels, kh, kw), jnp.float32,
            minval=-bound, maxval=bound)

    def __call__(self, x):
        # Plain conv2d with no bias — exactly what the reference forward does.
        return conv2d_pallas(x, self.conv_weight, self.stride, self.padding,
                             self.dilation, self.compute_dtype)


if __name__ == "__main__":
    key = jax.random.PRNGKey(0)
    k_w, k_x = jax.random.split(key)

    N, Cin, Cout, H, W = 2, 4, 8, 16, 16
    x = jax.random.normal(k_x, (N, Cin, H, W), jnp.float32)

    def reference(x, w, stride, padding, dilation):
        return jax.lax.conv_general_dilated(
            x, w, window_strides=stride,
            padding=((padding[0], padding[0]), (padding[1], padding[1])),
            rhs_dilation=dilation,
            dimension_numbers=("NCHW", "OIHW", "NCHW"))

    # Case 1: nominal config (3x3, stride 1, pad 1).
    m1 = DeformableConv2D(Cin, Cout, kernel_size=3, stride=1, padding=1,
                          dilation=1, deformable_groups=1, key=k_w)
    out1 = jax.block_until_ready(m1(x))
    assert out1.shape == (N, Cout, H, W), out1.shape
    ref1 = reference(x, m1.conv_weight, m1.stride, m1.padding, m1.dilation)
    assert jnp.allclose(out1, ref1, atol=2e-4, rtol=2e-4), \
        float(jnp.max(jnp.abs(out1 - ref1)))

    # Case 2: strided (exercises the stride-phase path).
    m2 = DeformableConv2D(Cin, Cout, kernel_size=3, stride=2, padding=1,
                          dilation=1, deformable_groups=1, key=k_w)
    out2 = jax.block_until_ready(m2(x))
    ref2 = reference(x, m2.conv_weight, m2.stride, m2.padding, m2.dilation)
    assert out2.shape == ref2.shape, (out2.shape, ref2.shape)
    assert jnp.allclose(out2, ref2, atol=2e-4, rtol=2e-4), \
        float(jnp.max(jnp.abs(out2 - ref2)))

    # Case 3: dilated.
    m3 = DeformableConv2D(Cin, Cout, kernel_size=3, stride=1, padding=2,
                          dilation=2, deformable_groups=1, key=k_w)
    out3 = jax.block_until_ready(m3(x))
    ref3 = reference(x, m3.conv_weight, m3.stride, m3.padding, m3.dilation)
    assert out3.shape == ref3.shape, (out3.shape, ref3.shape)
    assert jnp.allclose(out3, ref3, atol=2e-4, rtol=2e-4), \
        float(jnp.max(jnp.abs(out3 - ref3)))

    # Case 4: bf16 compute path (f32 MXU accumulation), looser tolerance.
    m4 = DeformableConv2D(Cin, Cout, kernel_size=3, stride=1, padding=1,
                          dilation=1, deformable_groups=1, key=k_w,
                          compute_dtype=jnp.bfloat16)
    out4 = jax.block_until_ready(m4(x))
    assert out4.shape == ref1.shape
    assert jnp.allclose(out4, ref1, atol=8e-2, rtol=8e-2), \
        float(jnp.max(jnp.abs(out4 - ref1)))

    print("KERNEL_OK")
</pallas_src>

<mosaic_0001>
module attributes {stable_mosaic.version = 11 : i64} {
  func.func @kernel(%arg0: i32, %arg1: i32, %arg2: i32, %arg3: memref<1x18x18x4xf32, #tpu.memory_space<vmem>>, %arg4: memref<9x4x128xf32, #tpu.memory_space<vmem>>, %arg5: memref<1x16x16x128xf32, #tpu.memory_space<vmem>>, %arg6: memref<256x128xf32, #tpu.memory_space<vmem>>) attributes {dimension_semantics = [#tpu.dimension_semantics<parallel>, #tpu.dimension_semantics<parallel>, #tpu.dimension_semantics<parallel>], iteration_bounds = array<i64: 2, 1, 1>, scalar_prefetch = 0 : i64, scratch_operands = 1 : i64, tpu.core_type = #tpu.core_type<tc>, window_params = [{transform_indices = @transform_0, window_bounds = array<i64: 1, 18, 18, 4>}, {pipeline_mode = #tpu.pipeline_mode<synchronous>, transform_indices = @transform_1, window_bounds = array<i64: 9, 4, 128>}, {transform_indices = @transform_2, window_bounds = array<i64: 1, 16, 16, 128>}]} {
    %c16_i32 = arith.constant 16 : i32
    %0 = arith.muli %arg1, %c16_i32 : i32
    %1 = tpu.assume_multiple %0, 8 : i32
    %c0_i32 = arith.constant 0 : i32
    %2 = arith.addi %c0_i32, %1 : i32
    %c0 = arith.constant 0 : index
    %3 = arith.index_cast %2 : i32 to index
    %c0_0 = arith.constant 0 : index
    %c0_1 = arith.constant 0 : index
    %4 = vector.load %arg3[%c0, %3, %c0_0, %c0_1] : memref<1x18x18x4xf32, #tpu.memory_space<vmem>>, vector<1x16x16x4xf32>
    %5 = vector.shape_cast %4 : vector<1x16x16x4xf32> to vector<16x16x4xf32>
    %6 = vector.shape_cast %5 : vector<16x16x4xf32> to vector<256x4xf32>
    %c0_2 = arith.constant 0 : index
    %c0_3 = arith.constant 0 : index
    %c0_4 = arith.constant 0 : index
    %7 = vector.load %arg4[%c0_2, %c0_3, %c0_4] : memref<9x4x128xf32, #tpu.memory_space<vmem>>, vector<1x4x128xf32>
    %8 = vector.shape_cast %7 : vector<1x4x128xf32> to vector<4x128xf32>
    %cst = arith.constant dense<0.000000e+00> : vector<256x128xf32>
    %9 = tpu.matmul %6, %8, %cst {dimension_numbers = #tpu.dot_dimension_numbers<[1], [0], [0], [1], [0, 0, 1, 1], [], []>} : vector<256x4xf32>, vector<4x128xf32>, vector<256x128xf32> -> vector<256x128xf32>
    %c0_5 = arith.constant 0 : index
    %c0_6 = arith.constant 0 : index
    %10 = vector.load %arg6[%c0_5, %c0_6] : memref<256x128xf32, #tpu.memory_space<vmem>>, vector<256x128xf32>
    tpu.vector_store %arg6[%c0_5, %c0_6], %9 {strides = array<i32>} : memref<256x128xf32, #tpu.memory_space<vmem>>, vector<256x128xf32>,
    %c0_i32_7 = arith.constant 0 : i32
    %11 = arith.addi %c0_i32_7, %1 : i32
    %c0_8 = arith.constant 0 : index
    %12 = arith.index_cast %11 : i32 to index
    %c1 = arith.constant 1 : index
    %c0_9 = arith.constant 0 : index
    %13 = vector.load %arg3[%c0_8, %12, %c1, %c0_9] : memref<1x18x18x4xf32, #tpu.memory_space<vmem>>, vector<1x16x16x4xf32>
    %14 = vector.shape_cast %13 : vector<1x16x16x4xf32> to vector<16x16x4xf32>
    %15 = vector.shape_cast %14 : vector<16x16x4xf32> to vector<256x4xf32>
    %c1_10 = arith.constant 1 : index
    %c0_11 = arith.constant 0 : index
    %c0_12 = arith.constant 0 : index
    %16 = vector.load %arg4[%c1_10, %c0_11, %c0_12] : memref<9x4x128xf32, #tpu.memory_space<vmem>>, vector<1x4x128xf32>
    %17 = vector.shape_cast %16 : vector<1x4x128xf32> to vector<4x128xf32>
    %cst_13 = arith.constant dense<0.000000e+00> : vector<256x128xf32>
    %18 = tpu.matmul %15, %17, %cst_13 {dimension_numbers = #tpu.dot_dimension_numbers<[1], [0], [0], [1], [0, 0, 1, 1], [], []>} : vector<256x4xf32>, vector<4x128xf32>, vector<256x128xf32> -> vector<256x128xf32>
    %c0_14 = arith.constant 0 : index
    %c0_15 = arith.constant 0 : index
    %19 = vector.load %arg6[%c0_14, %c0_15] : memref<256x128xf32, #tpu.memory_space<vmem>>, vector<256x128xf32>
    %20 = arith.addf %19, %18 : vector<256x128xf32>
    %c0_16 = arith.constant 0 : index
    %c0_17 = arith.constant 0 : index
    %21 = vector.load %arg6[%c0_16, %c0_17] : memref<256x128xf32, #tpu.memory_space<vmem>>, vector<256x128xf32>
    tpu.vector_store %arg6[%c0_16, %c0_17], %20 {strides = array<i32>} : memref<256x128xf32, #tpu.memory_space<vmem>>, vector<256x128xf32>,
    %c0_i32_18 = arith.constant 0 : i32
    %22 = arith.addi %c0_i32_18, %1 : i32
    %c0_19 = arith.constant 0 : index
    %23 = arith.index_cast %22 : i32 to index
    %c2 = arith.constant 2 : index
    %c0_20 = arith.constant 0 : index
    %24 = vector.load %arg3[%c0_19, %23, %c2, %c0_20] : memref<1x18x18x4xf32, #tpu.memory_space<vmem>>, vector<1x16x16x4xf32>
    %25 = vector.shape_cast %24 : vector<1x16x16x4xf32> to vector<16x16x4xf32>
    %26 = vector.shape_cast %25 : vector<16x16x4xf32> to vector<256x4xf32>
    %c2_21 = arith.constant 2 : index
    %c0_22 = arith.constant 0 : index
    %c0_23 = arith.constant 0 : index
    %27 = vector.load %arg4[%c2_21, %c0_22, %c0_23] : memref<9x4x128xf32, #tpu.memory_space<vmem>>, vector<1x4x128xf32>
    %28 = vector.shape_cast %27 : vector<1x4x128xf32> to vector<4x128xf32>
    %cst_24 = arith.constant dense<0.000000e+00> : vector<256x128xf32>
    %29 = tpu.matmul %26, %28, %cst_24 {dimension_numbers = #tpu.dot_dimension_numbers<[1], [0], [0], [1], [0, 0, 1, 1], [], []>} : vector<256x4xf32>, vector<4x128xf32>, vector<256x128xf32> -> vector<256x128xf32>
    %c0_25 = arith.constant 0 : index
    %c0_26 = arith.constant 0 : index
    %30 = vector.load %arg6[%c0_25, %c0_26] : memref<256x128xf32, #tpu.memory_space<vmem>>, vector<256x128xf32>
    %31 = arith.addf %30, %29 : vector<256x128xf32>
    %c0_27 = arith.constant 0 : index
    %c0_28 = arith.constant 0 : index
    %32 = vector.load %arg6[%c0_27, %c0_28] : memref<256x128xf32, #tpu.memory_space<vmem>>, vector<256x128xf32>
    tpu.vector_store %arg6[%c0_27, %c0_28], %31 {strides = array<i32>} : memref<256x128xf32, #tpu.memory_space<vmem>>, vector<256x128xf32>,
    %c1_i32 = arith.constant 1 : i32
    %33 = arith.addi %c1_i32, %1 : i32
    %c0_29 = arith.constant 0 : index
    %34 = arith.index_cast %33 : i32 to index
    %c0_30 = arith.constant 0 : index
    %c0_31 = arith.constant 0 : index
    %35 = vector.load %arg3[%c0_29, %34, %c0_30, %c0_31] : memref<1x18x18x4xf32, #tpu.memory_space<vmem>>, vector<1x16x16x4xf32>
    %36 = vector.shape_cast %35 : vector<1x16x16x4xf32> to vector<16x16x4xf32>
    %37 = vector.shape_cast %36 : vector<16x16x4xf32> to vector<256x4xf32>
    %c3 = arith.constant 3 : index
    %c0_32 = arith.constant 0 : index
    %c0_33 = arith.constant 0 : index
    %38 = vector.load %arg4[%c3, %c0_32, %c0_33] : memref<9x4x128xf32, #tpu.memory_space<vmem>>, vector<1x4x128xf32>
    %39 = vector.shape_cast %38 : vector<1x4x128xf32> to vector<4x128xf32>
    %cst_34 = arith.constant dense<0.000000e+00> : vector<256x128xf32>
    %40 = tpu.matmul %37, %39, %cst_34 {dimension_numbers = #tpu.dot_dimension_numbers<[1], [0], [0], [1], [0, 0, 1, 1], [], []>} : vector<256x4xf32>, vector<4x128xf32>, vector<256x128xf32> -> vector<256x128xf32>
    %c0_35 = arith.constant 0 : index
    %c0_36 = arith.constant 0 : index
    %41 = vector.load %arg6[%c0_35, %c0_36] : memref<256x128xf32, #tpu.memory_space<vmem>>, vector<256x128xf32>
    %42 = arith.addf %41, %40 : vector<256x128xf32>
    %c0_37 = arith.constant 0 : index
    %c0_38 = arith.constant 0 : index
    %43 = vector.load %arg6[%c0_37, %c0_38] : memref<256x128xf32, #tpu.memory_space<vmem>>, vector<256x128xf32>
    tpu.vector_store %arg6[%c0_37, %c0_38], %42 {strides = array<i32>} : memref<256x128xf32, #tpu.memory_space<vmem>>, vector<256x128xf32>,
    %c1_i32_39 = arith.constant 1 : i32
    %44 = arith.addi %c1_i32_39, %1 : i32
    %c0_40 = arith.constant 0 : index
    %45 = arith.index_cast %44 : i32 to index
    %c1_41 = arith.constant 1 : index
    %c0_42 = arith.constant 0 : index
    %46 = vector.load %arg3[%c0_40, %45, %c1_41, %c0_42] : memref<1x18x18x4xf32, #tpu.memory_space<vmem>>, vector<1x16x16x4xf32>
    %47 = vector.shape_cast %46 : vector<1x16x16x4xf32> to vector<16x16x4xf32>
    %48 = vector.shape_cast %47 : vector<16x16x4xf32> to vector<256x4xf32>
    %c4 = arith.constant 4 : index
    %c0_43 = arith.constant 0 : index
    %c0_44 = arith.constant 0 : index
    %49 = vector.load %arg4[%c4, %c0_43, %c0_44] : memref<9x4x128xf32, #tpu.memory_space<vmem>>, vector<1x4x128xf32>
    %50 = vector.shape_cast %49 : vector<1x4x128xf32> to vector<4x128xf32>
    %cst_45 = arith.constant dense<0.000000e+00> : vector<256x128xf32>
    %51 = tpu.matmul %48, %50, %cst_45 {dimension_numbers = #tpu.dot_dimension_numbers<[1], [0], [0], [1], [0, 0, 1, 1], [], []>} : vector<256x4xf32>, vector<4x128xf32>, vector<256x128xf32> -> vector<256x128xf32>
    %c0_46 = arith.constant 0 : index
    %c0_47 = arith.constant 0 : index
    %52 = vector.load %arg6[%c0_46, %c0_47] : memref<256x128xf32, #tpu.memory_space<vmem>>, vector<256x128xf32>
    %53 = arith.addf %52, %51 : vector<256x128xf32>
    %c0_48 = arith.constant 0 : index
    %c0_49 = arith.constant 0 : index
    %54 = vector.load %arg6[%c0_48, %c0_49] : memref<256x128xf32, #tpu.memory_space<vmem>>, vector<256x128xf32>
    tpu.vector_store %arg6[%c0_48, %c0_49], %53 {strides = array<i32>} : memref<256x128xf32, #tpu.memory_space<vmem>>, vector<256x128xf32>,
    %c1_i32_50 = arith.constant 1 : i32
    %55 = arith.addi %c1_i32_50, %1 : i32
    %c0_51 = arith.constant 0 : index
    %56 = arith.index_cast %55 : i32 to index
    %c2_52 = arith.constant 2 : index
    %c0_53 = arith.constant 0 : index
    %57 = vector.load %arg3[%c0_51, %56, %c2_52, %c0_53] : memref<1x18x18x4xf32, #tpu.memory_space<vmem>>, vector<1x16x16x4xf32>
    %58 = vector.shape_cast %57 : vector<1x16x16x4xf32> to vector<16x16x4xf32>
    %59 = vector.shape_cast %58 : vector<16x16x4xf32> to vector<256x4xf32>
    %c5 = arith.constant 5 : index
    %c0_54 = arith.constant 0 : index
    %c0_55 = arith.constant 0 : index
    %60 = vector.load %arg4[%c5, %c0_54, %c0_55] : memref<9x4x128xf32, #tpu.memory_space<vmem>>, vector<1x4x128xf32>
    %61 = vector.shape_cast %60 : vector<1x4x128xf32> to vector<4x128xf32>
    %cst_56 = arith.constant dense<0.000000e+00> : vector<256x128xf32>
    %62 = tpu.matmul %59, %61, %cst_56 {dimension_numbers = #tpu.dot_dimension_numbers<[1], [0], [0], [1], [0, 0, 1, 1], [], []>} : vector<256x4xf32>, vector<4x128xf32>, vector<256x128xf32> -> vector<256x128xf32>
    %c0_57 = arith.constant 0 : index
    %c0_58 = arith.constant 0 : index
    %63 = vector.load %arg6[%c0_57, %c0_58] : memref<256x128xf32, #tpu.memory_space<vmem>>, vector<256x128xf32>
    %64 = arith.addf %63, %62 : vector<256x128xf32>
    %c0_59 = arith.constant 0 : index
    %c0_60 = arith.constant 0 : index
    %65 = vector.load %arg6[%c0_59, %c0_60] : memref<256x128xf32, #tpu.memory_space<vmem>>, vector<256x128xf32>
    tpu.vector_store %arg6[%c0_59, %c0_60], %64 {strides = array<i32>} : memref<256x128xf32, #tpu.memory_space<vmem>>, vector<256x128xf32>,
    %c2_i32 = arith.constant 2 : i32
    %66 = arith.addi %c2_i32, %1 : i32
    %c0_61 = arith.constant 0 : index
    %67 = arith.index_cast %66 : i32 to index
    %c0_62 = arith.constant 0 : index
    %c0_63 = arith.constant 0 : index
    %68 = vector.load %arg3[%c0_61, %67, %c0_62, %c0_63] : memref<1x18x18x4xf32, #tpu.memory_space<vmem>>, vector<1x16x16x4xf32>
    %69 = vector.shape_cast %68 : vector<1x16x16x4xf32> to vector<16x16x4xf32>
    %70 = vector.shape_cast %69 : vector<16x16x4xf32> to vector<256x4xf32>
    %c6 = arith.constant 6 : index
    %c0_64 = arith.constant 0 : index
    %c0_65 = arith.constant 0 : index
    %71 = vector.load %arg4[%c6, %c0_64, %c0_65] : memref<9x4x128xf32, #tpu.memory_space<vmem>>, vector<1x4x128xf32>
    %72 = vector.shape_cast %71 : vector<1x4x128xf32> to vector<4x128xf32>
    %cst_66 = arith.constant dense<0.000000e+00> : vector<256x128xf32>
    %73 = tpu.matmul %70, %72, %cst_66 {dimension_numbers = #tpu.dot_dimension_numbers<[1], [0], [0], [1], [0, 0, 1, 1], [], []>} : vector<256x4xf32>, vector<4x128xf32>, vector<256x128xf32> -> vector<256x128xf32>
    %c0_67 = arith.constant 0 : index
    %c0_68 = arith.constant 0 : index
    %74 = vector.load %arg6[%c0_67, %c0_68] : memref<256x128xf32, #tpu.memory_space<vmem>>, vector<256x128xf32>
    %75 = arith.addf %74, %73 : vector<256x128xf32>
    %c0_69 = arith.constant 0 : index
    %c0_70 = arith.constant 0 : index
    %76 = vector.load %arg6[%c0_69, %c0_70] : memref<256x128xf32, #tpu.memory_space<vmem>>, vector<256x128xf32>
    tpu.vector_store %arg6[%c0_69, %c0_70], %75 {strides = array<i32>} : memref<256x128xf32, #tpu.memory_space<vmem>>, vector<256x128xf32>,
    %c2_i32_71 = arith.constant 2 : i32
    %77 = arith.addi %c2_i32_71, %1 : i32
    %c0_72 = arith.constant 0 : index
    %78 = arith.index_cast %77 : i32 to index
    %c1_73 = arith.constant 1 : index
    %c0_74 = arith.constant 0 : index
    %79 = vector.load %arg3[%c0_72, %78, %c1_73, %c0_74] : memref<1x18x18x4xf32, #tpu.memory_space<vmem>>, vector<1x16x16x4xf32>
    %80 = vector.shape_cast %79 : vector<1x16x16x4xf32> to vector<16x16x4xf32>
    %81 = vector.shape_cast %80 : vector<16x16x4xf32> to vector<256x4xf32>
    %c7 = arith.constant 7 : index
    %c0_75 = arith.constant 0 : index
    %c0_76 = arith.constant 0 : index
    %82 = vector.load %arg4[%c7, %c0_75, %c0_76] : memref<9x4x128xf32, #tpu.memory_space<vmem>>, vector<1x4x128xf32>
    %83 = vector.shape_cast %82 : vector<1x4x128xf32> to vector<4x128xf32>
    %cst_77 = arith.constant dense<0.000000e+00> : vector<256x128xf32>
    %84 = tpu.matmul %81, %83, %cst_77 {dimension_numbers = #tpu.dot_dimension_numbers<[1], [0], [0], [1], [0, 0, 1, 1], [], []>} : vector<256x4xf32>, vector<4x128xf32>, vector<256x128xf32> -> vector<256x128xf32>
    %c0_78 = arith.constant 0 : index
    %c0_79 = arith.constant 0 : index
    %85 = vector.load %arg6[%c0_78, %c0_79] : memref<256x128xf32, #tpu.memory_space<vmem>>, vector<256x128xf32>
    %86 = arith.addf %85, %84 : vector<256x128xf32>
    %c0_80 = arith.constant 0 : index
    %c0_81 = arith.constant 0 : index
    %87 = vector.load %arg6[%c0_80, %c0_81] : memref<256x128xf32, #tpu.memory_space<vmem>>, vector<256x128xf32>
    tpu.vector_store %arg6[%c0_80, %c0_81], %86 {strides = array<i32>} : memref<256x128xf32, #tpu.memory_space<vmem>>, vector<256x128xf32>,
    %c2_i32_82 = arith.constant 2 : i32
    %88 = arith.addi %c2_i32_82, %1 : i32
    %c0_83 = arith.constant 0 : index
    %89 = arith.index_cast %88 : i32 to index
    %c2_84 = arith.constant 2 : index
    %c0_85 = arith.constant 0 : index
    %90 = vector.load %arg3[%c0_83, %89, %c2_84, %c0_85] : memref<1x18x18x4xf32, #tpu.memory_space<vmem>>, vector<1x16x16x4xf32>
    %91 = vector.shape_cast %90 : vector<1x16x16x4xf32> to vector<16x16x4xf32>
    %92 = vector.shape_cast %91 : vector<16x16x4xf32> to vector<256x4xf32>
    %c8 = arith.constant 8 : index
    %c0_86 = arith.constant 0 : index
    %c0_87 = arith.constant 0 : index
    %93 = vector.load %arg4[%c8, %c0_86, %c0_87] : memref<9x4x128xf32, #tpu.memory_space<vmem>>, vector<1x4x128xf32>
    %94 = vector.shape_cast %93 : vector<1x4x128xf32> to vector<4x128xf32>
    %cst_88 = arith.constant dense<0.000000e+00> : vector<256x128xf32>
    %95 = tpu.matmul %92, %94, %cst_88 {dimension_numbers = #tpu.dot_dimension_numbers<[1], [0], [0], [1], [0, 0, 1, 1], [], []>} : vector<256x4xf32>, vector<4x128xf32>, vector<256x128xf32> -> vector<256x128xf32>
    %c0_89 = arith.constant 0 : index
    %c0_90 = arith.constant 0 : index
    %96 = vector.load %arg6[%c0_89, %c0_90] : memref<256x128xf32, #tpu.memory_space<vmem>>, vector<256x128xf32>
    %97 = arith.addf %96, %95 : vector<256x128xf32>
    %c0_91 = arith.constant 0 : index
    %c0_92 = arith.constant 0 : index
    %98 = vector.load %arg6[%c0_91, %c0_92] : memref<256x128xf32, #tpu.memory_space<vmem>>, vector<256x128xf32>
    tpu.vector_store %arg6[%c0_91, %c0_92], %97 {strides = array<i32>} : memref<256x128xf32, #tpu.memory_space<vmem>>, vector<256x128xf32>,
    %c0_93 = arith.constant 0 : index
    %c0_94 = arith.constant 0 : index
    %99 = vector.load %arg6[%c0_93, %c0_94] : memref<256x128xf32, #tpu.memory_space<vmem>>, vector<256x128xf32>
    %100 = vector.shape_cast %99 : vector<256x128xf32> to vector<16x16x128xf32>
    %c0_95 = arith.constant 0 : index
    %c0_96 = arith.constant 0 : index
    %c0_97 = arith.constant 0 : index
    %c0_98 = arith.constant 0 : index
    %101 = vector.load %arg5[%c0_95, %c0_96, %c0_97, %c0_98] : memref<1x16x16x128xf32, #tpu.memory_space<vmem>>, vector<1x16x16x128xf32>
    %102 = vector.shape_cast %101 : vector<1x16x16x128xf32> to vector<16x16x128xf32>
    %103 = vector.shape_cast %100 : vector<16x16x128xf32> to vector<1x16x16x128xf32>
    tpu.vector_store %arg5[%c0_95, %c0_96, %c0_97, %c0_98], %103 {strides = array<i32>} : memref<1x16x16x128xf32, #tpu.memory_space<vmem>>, vector<1x16x16x128xf32>,
    return
  }
  func.func @transform_0(%arg0: i32, %arg1: i32, %arg2: i32) -> (i32, i32, i32, i32) {
    %c0_i32 = arith.constant 0 : i32
    %c0_i32_0 = arith.constant 0 : i32
    %c0_i32_1 = arith.constant 0 : i32
    %c0_i32_2 = arith.constant 0 : i32
    return %arg0, %c0_i32, %c0_i32_0, %c0_i32_1 : i32, i32, i32, i32
  }
  func.func @transform_1(%arg0: i32, %arg1: i32, %arg2: i32) -> (i32, i32, i32) {
    %c0_i32 = arith.constant 0 : i32
    %c0_i32_0 = arith.constant 0 : i32
    %c0_i32_1 = arith.constant 0 : i32
    %c0_i32_2 = arith.constant 0 : i32
    return %c0_i32, %c0_i32_0, %c0_i32_1 : i32, i32, i32
  }
  func.func @transform_2(%arg0: i32, %arg1: i32, %arg2: i32) -> (i32, i32, i32, i32) {
    %c0_i32 = arith.constant 0 : i32
    %c0_i32_0 = arith.constant 0 : i32
    return %arg0, %arg1, %arg2, %c0_i32 : i32, i32, i32, i32
  }
}

</mosaic_0001>

<bundles_post_ra>
// kernel: conv2d_pallas.1
= control target key start
LH: loop header
LB: loop body
LE: loop exit
PB: predicated region body
PF: predicated region fallthrough
CT: control target
= control target key end

     0   :  { %s3963_s9 = smov 0   ;;  %s3965_s10 = smov 0   ;;  %s5107_s0 = inlined_call_operand.vmem [shape: f32[2,18,18,4], index: 0, kind: input, shape index: {}]   ;;  %s5108_s1 = inlined_call_operand.vmem [shape: f32[9,4,128], index: 1, kind: input, shape index: {}]   ;;  %s5109_s2 = inlined_call_operand.vmem [shape: f32[2,16,16,128], index: 2, kind: output, shape index: {}]  }
   0x1   :  { %s3967_s11 = smov 0  }
   0x2 LB: > { %s31_s12 = sadd.s32 1, %s3942_s10  ;;  %p3392_p0 = scmp.ge.s32.totalorder %s3946_s11, 1  ;;  %s3946_s11 = sphi %s3967_s11, %s12_s11   ;;  %s3942_s10 = sphi %s3965_s10, %s5226_s10   ;;  %s3938_s9 = sphi %s3963_s9, %s5225_s9  }
   0x3   : > { %p33_p1 = scmp.ge.s32.totalorder %s31_s12, 2  ;;  %p135_p2 = scmp.lt.s32.totalorder %s3946_s11, 3 }
   0x5   : > { %s5228_s12 = smov (%p33_p1, %s31_s12), 0  ;;  %p136_p3 = pnand %p3392_p0, %p135_p2 }
   0x7   : > { %139 = sbr.rel (%p136_p3) target bundleno = 727 (0x2d7), region = 28 }
   0xc   : > { %v222_v0 = vld [vmem:[%s5108_s1] sm:$0xf]  ;;  %vm320_vm0 = vcmask 1043456   ;;  %p166_p4 = scmp.lt.s32.totalorder %s3938_s9, 1  ;;  %v3463_v1 = vld [vmem:[%s5108_s1 + $0x8] sm:$0xf] }
   0xd   : > { %3896 = vmatpush.msk.msra.mxu1 %vm320_vm0, %v222_v0  ;;  %3897 = vmatpush.msk.msra.mxu2 %vm320_vm0, %v222_v0  ;;  %v3529_v2 = vld [vmem:[%s5108_s1 + $0xc] sm:$0xf]  ;;  %v3429_v3 = vld [vmem:[%s5108_s1 + $0x4] sm:$0xf]  ;;  %v3595_v4 = vld [vmem:[%s5108_s1 + $0x10] sm:$0xf] }
   0xe   : > { %s5230_s9 = smov (!%p166_p4, %s3938_s9), 1  ;;  %3898 = vmatpush.msk.msra.mxu3 %vm320_vm0, %v222_v0  ;;  %3396 = vmatpush.msk.msra.mxu0 %vm320_vm0, %v222_v0  ;;  %vm223_vm1 = vcmask 31744   ;;  %v3727_v25 = vld [vmem:[%s5108_s1 + $0x18] sm:$0xf]  ;;  %v3793_v26 = vld [vmem:[%s5108_s1 + $0x1c] sm:$0xf] }
   0xf   : > { %3464 = vmatpush.msk.msrb.mxu2 %vm320_vm0, %v3463_v1  ;;  %3430 = vmatpush.msk.msrb.mxu1 %vm320_vm0, %v3429_v3  ;;  %s3899_s23 = smul.u32 432, %s5230_s9  ;;  %v3661_v27 = vld [vmem:[%s5108_s1 + $0x14] sm:$0xf]  ;;  %v3859_v32 = vld [vmem:[%s5108_s1 + $0x20] sm:$0xf]  ;;  %s3895_s7 = sshll.u32 %s5230_s9, 8 }
  0x10   : > { %3530 = vmatpush.msk.msrb.mxu3 %vm320_vm0, %v3529_v2  ;;  %3596 = vmatpush.msk.msrb.mxu0 %vm320_vm0, %v3595_v4  ;;  %s4916_s14 = scalar_lea.vmem %s5109_s2, %s3895_s7 }
  0x11   : > { %s4010_s26 = scalar_lea.vmem %s5107_s0, %s3899_s23 }
  0x12   : > { %v4013_v5 = vld [vmem:[%s4010_s26 + $0x60] sm:$0xff]  ;;  %v4030_v9 = vld [vmem:[%s4010_s26 + $0x68] sm:$0xff]  ;;  %v4047_v13 = vld [vmem:[%s4010_s26 + $0x78] sm:$0xff] }
  0x13   : > { %v4016_v6 = vld [vmem:[%s4010_s26 + $0xc0] sm:$0xff]  ;;  %3405 = vmatmul.msk.f32.vlgmr.msra.gmra.mxu1 %vm223_vm1, %v4013_v5  ;;  %v4033_v10 = vld [vmem:[%s4010_s26 + $0xc8] sm:$0xff]  ;;  %v4050_v14 = vld [vmem:[%s4010_s26 + $0xd8] sm:$0xff] }
  0x14   : > { %v4019_v7 = vld [vmem:[%s4010_s26 + $0x120] sm:$0xff]  ;;  %3413 = vmatmul.msk.f32.vlgmr.msra.gmra.mxu2 %vm223_vm1, %v4016_v6  ;;  %v4036_v11 = vld [vmem:[%s4010_s26 + $0x128] sm:$0xff]  ;;  %v4053_v15 = vld [vmem:[%s4010_s26 + $0x138] sm:$0xff]  ;;  %3662 = vmatpush.msk.msra.mxu1 %vm320_vm0, %v3661_v27 }
  0x15   : > { %v190_v8 = vld [vmem:[%s4010_s26] sm:$0xff]  ;;  %3421 = vmatmul.msk.f32.vlgmr.msra.gmra.mxu3 %vm223_vm1, %v4019_v7  ;;  %v191_v12 = vld [vmem:[%s4010_s26 + $0x8] sm:$0xff]  ;;  %v192_v16 = vld [vmem:[%s4010_s26 + $0x18] sm:$0xff]  ;;  %3728 = vmatpush.msk.msra.mxu2 %vm320_vm0, %v3727_v25 }
  0x16   : > { %3397 = vmatmul.msk.f32.vlgmr.msra.gmra.mxu0 %vm223_vm1, %v190_v8  ;;  %v4064_v17 = vld [vmem:[%s4010_s26 + $0x80] sm:$0xff]  ;;  %v4081_v21 = vld [vmem:[%s4010_s26 + $0x90] sm:$0xff]  ;;  %3794 = vmatpush.msk.msra.mxu3 %vm320_vm0, %v3793_v26  ;;  %v4113_v28 = vld [vmem:[%s4010_s26 + $0x98] sm:$0xff] }
  0x17   : > { %v4067_v18 = vld [vmem:[%s4010_s26 + $0xe0] sm:$0xff]  ;;  %v4084_v22 = vld [vmem:[%s4010_s26 + $0xf0] sm:$0xff]  ;;  %v4116_v29 = vld [vmem:[%s4010_s26 + $0xf8] sm:$0xff]  ;;  %3860 = vmatpush.msk.msra.mxu0 %vm320_vm0, %v3859_v32 }
  0x18   : > { %v4070_v19 = vld [vmem:[%s4010_s26 + $0x140] sm:$0xff]  ;;  %v4087_v23 = vld [vmem:[%s4010_s26 + $0x150] sm:$0xff]  ;;  %v4119_v30 = vld [vmem:[%s4010_s26 + $0x158] sm:$0xff] }
  0x19   : > { %v193_v20 = vld [vmem:[%s4010_s26 + $0x20] sm:$0xff]  ;;  %v4090_v24 = vld [vmem:[%s4010_s26 + $0x30] sm:$0xff]  ;;  %v4122_v31 = vld [vmem:[%s4010_s26 + $0x38] sm:$0xff] }
  0x1a   : > { %v4137_v33 = vld [vmem:[%s4010_s26 + $0xa8] sm:$0xff]  ;;  %v4157_v37 = vld [vmem:[%s4010_s26 + $0xb0] sm:$0xff]  ;;  %v3563_v43 = vld [vmem:[%s4010_s26 + $0x19] sm:$0xff] }
  0x1b   : > { %3406 = vmatmul.msk.f32.gmra.mxu1 %vm223_vm1, %v4030_v9  ;;  %v4140_v34 = vld [vmem:[%s4010_s26 + $0x108] sm:$0xff]  ;;  %v4160_v38 = vld [vmem:[%s4010_s26 + $0x110] sm:$0xff]  ;;  %v4191_v47 = vld [vmem:[%s4010_s26 + $0x1a] sm:$0xff] }
  0x1c   : > { %3414 = vmatmul.msk.f32.gmra.mxu2 %vm223_vm1, %v4033_v10  ;;  %v4143_v35 = vld [vmem:[%s4010_s26 + $0x168] sm:$0xff]  ;;  %v4163_v39 = vld [vmem:[%s4010_s26 + $0x170] sm:$0xff]  ;;  %v4207_v50 = vld [vmem:[%s4010_s26 + $0x39] sm:$0xff] }
  0x1d   : > { %3422 = vmatmul.msk.f32.gmra.mxu3 %vm223_vm1, %v4036_v11  ;;  %v4146_v36 = vld [vmem:[%s4010_s26 + $0x48] sm:$0xff]  ;;  %v4166_v40 = vld [vmem:[%s4010_s26 + $0x50] sm:$0xff]  ;;  %v4231_v53 = vld [vmem:[%s4010_s26 + $0x3a] sm:$0xff] }
  0x1e   : > { %3398 = vmatmul.msk.f32.gmra.mxu0 %vm223_vm1, %v191_v12  ;;  %v469_v41 = vld [vmem:[%s4010_s26 + $0x1] sm:$0xff]  ;;  %v470_v44 = vld [vmem:[%s4010_s26 + $0x9] sm:$0xff]  ;;  %v4194_v48 = vld [vmem:[%s4010_s26 + $0x31] sm:$0xff] }
  0x1f   : > { %v811_v42 = vld [vmem:[%s4010_s26 + $0x2] sm:$0xff]  ;;  %v812_v45 = vld [vmem:[%s4010_s26 + $0xa] sm:$0xff]  ;;  %v4217_v51 = vld [vmem:[%s4010_s26 + $0x32] sm:$0xff] }
  0x20   : > { %v3564_v46 = vld [vmem:[%s4010_s26 + $0x21] sm:$0xff]  ;;  %v4220_v52 = vld [vmem:[%s4010_s26 + $0x49] sm:$0xff]  ;;  %v4234_v54 = vld [vmem:[%s4010_s26 + $0x51] sm:$0xff] }
  0x21   : > { %v4204_v49 = vld [vmem:[%s4010_s26 + $0x22] sm:$0xff]  ;;  %v4245_v55 = vld [vmem:[%s4010_s26 + $0x4a] sm:$0xff]  ;;  %v4259_v57 = vld [vmem:[%s4010_s26 + $0x52] sm:$0xff] }
  0x22   : > { %v4248_v56 = vld [vmem:[%s4010_s26 + $0x61] sm:$0xff]  ;;  %v4262_v58 = vld [vmem:[%s4010_s26 + $0x69] sm:$0xff]  ;;  %v4280_v62 = vld [vmem:[%s4010_s26 + $0x79] sm:$0xff] }
  0x23   : > { %3407 = vmatmul.msk.f32.gmra.mxu1 %vm223_vm1, %v4047_v13  ;;  %5137 = vst [vmem:[#allocation3_spill] sm:$0xff] %v4262_v58  ;;  %v4275_v60 = vld [vmem:[%s4010_s26 + $0x62] sm:$0xff]  ;;  %v4297_v2 = vld [vmem:[%s4010_s26 + $0x6a] sm:$0xff]  ;;  %v4319_v12 = vld [vmem:[%s4010_s26 + $0x7a] sm:$0xff] }
  0x24   : > { %3415 = vmatmul.msk.f32.gmra.mxu2 %vm223_vm1, %v4050_v14  ;;  %5138 = vst [vmem:[#allocation4_spill] sm:$0xff] %v4280_v62  ;;  %v4302_v4 = vld [vmem:[%s4010_s26 + $0x81] sm:$0xff]  ;;  %v4346_v32 = vld [vmem:[%s4010_s26 + $0x99] sm:$0xff] }
  0x25   : > { %3423 = vmatmul.msk.f32.gmra.mxu3 %vm223_vm1, %v4053_v15  ;;  %5140 = vst [vmem:[#allocation6_spill] sm:$0xff] %v4297_v2  ;;  %v4341_v26 = vld [vmem:[%s4010_s26 + $0x82] sm:$0xff] }
  0x26   : > { %3399 = vmatmul.msk.f32.gmra.mxu0 %vm223_vm1, %v192_v16  ;;  %5141 = vst [vmem:[#allocation7_spill] sm:$0xff] %v4302_v4 }
  0x27   : > { %5143 = vst [vmem:[#allocation9_spill] sm:$0xff] %v4319_v12 }
  0x28   : > { %5146 = vst [vmem:[#allocation12_spill] sm:$0xff] %v4341_v26 }
  0x29   : > { %5147 = vst [vmem:[#allocation13_spill] sm:$0xff] %v4346_v32 }
  0x2b   : > { %3408 = vmatmul.msk.f32.gmra.mxu1 %vm223_vm1, %v4064_v17 }
  0x2c   : > { %3416 = vmatmul.msk.f32.gmra.mxu2 %vm223_vm1, %v4067_v18 }
  0x2d   : > { %3424 = vmatmul.msk.f32.gmra.mxu3 %vm223_vm1, %v4070_v19 }
  0x2e   : > { %3400 = vmatmul.msk.f32.gmra.mxu0 %vm223_vm1, %v193_v20 }
  0x33   : > { %3409 = vmatmul.msk.f32.gmra.mxu1 %vm223_vm1, %v4081_v21 }
  0x34   : > { %3417 = vmatmul.msk.f32.gmra.mxu2 %vm223_vm1, %v4084_v22 }
  0x35   : > { %3425 = vmatmul.msk.f32.gmra.mxu3 %vm223_vm1, %v4087_v23 }
  0x36   : > { %3401 = vmatmul.msk.f32.gmra.mxu0 %vm223_vm1, %v4090_v24 }
  0x3b   : > { %3410 = vmatmul.msk.f32.gmra.mxu1 %vm223_vm1, %v4113_v28 }
  0x3c   : > { %3418 = vmatmul.msk.f32.gmra.mxu2 %vm223_vm1, %v4116_v29 }
  0x3d   : > { %3426 = vmatmul.msk.f32.gmra.mxu3 %vm223_vm1, %v4119_v30 }
  0x3e   : > { %3402 = vmatmul.msk.f32.gmra.mxu0 %vm223_vm1, %v4122_v31 }
  0x43   : > { %3411 = vmatmul.msk.f32.gmra.mxu1 %vm223_vm1, %v4137_v33 }
  0x44   : > { %3419 = vmatmul.msk.f32.gmra.mxu2 %vm223_vm1, %v4140_v34 }
  0x45   : > { %3427 = vmatmul.msk.f32.gmra.mxu3 %vm223_vm1, %v4143_v35 }
  0x46   : > { %3403 = vmatmul.msk.f32.gmra.mxu0 %vm223_vm1, %v4146_v36 }
  0x4b   : > { %3412 = vmatmul.msk.f32.gmra.mxu1 %vm223_vm1, %v4157_v37 }
  0x4c   : > { %3420 = vmatmul.msk.f32.gmra.mxu2 %vm223_vm1, %v4160_v38 }
  0x4d   : > { %3428 = vmatmul.msk.f32.gmra.mxu3 %vm223_vm1, %v4163_v39 }
  0x4e   : > { %3404 = vmatmul.msk.f32.gmra.mxu0 %vm223_vm1, %v4166_v40 }
  0x53   : > { %3431 = vmatmul.msk.f32.vlgmr.msrb.gmra.mxu1 %vm223_vm1, %v469_v41 }
  0x54   : > { %3465 = vmatmul.msk.f32.vlgmr.msrb.gmra.mxu2 %vm223_vm1, %v811_v42 }
  0x55   : > { %3531 = vmatmul.msk.f32.vlgmr.msrb.gmra.mxu3 %vm223_vm1, %v192_v16  ;;  %v4324_v16 = vld [vmem:[%s4010_s26 + $0x91] sm:$0xff] }
  0x56   : > { %3597 = vmatmul.msk.f32.vlgmr.msrb.gmra.mxu0 %vm223_vm1, %v3563_v43  ;;  %5144 = vst [vmem:[#allocation10_spill] sm:$0xff] %v4324_v16 }
  0x5b   : > { %3432 = vmatmul.msk.f32.gmra.mxu1 %vm223_vm1, %v470_v44 }
  0x5c   : > { %3466 = vmatmul.msk.f32.gmra.mxu2 %vm223_vm1, %v812_v45  ;;  %v4368_v45 = vld [vmem:[%s4010_s26 + $0xa9] sm:$0xff] }
  0x5d   : > { %3532 = vmatmul.msk.f32.gmra.mxu3 %vm223_vm1, %v193_v20  ;;  %5150 = vst [vmem:[#allocation16_spill] sm:$0xff] %v4368_v45 }
  0x5e   : > { %3598 = vmatmul.msk.f32.gmra.mxu0 %vm223_vm1, %v3564_v46 }
  0x63   : > { %3433 = vmatmul.msk.f32.gmra.mxu1 %vm223_vm1, %v3563_v43  ;;  %v4363_v43 = vld [vmem:[%s4010_s26 + $0x92] sm:$0xff] }
  0x64   : > { %3467 = vmatmul.msk.f32.gmra.mxu2 %vm223_vm1, %v4191_v47  ;;  %5149 = vst [vmem:[#allocation15_spill] sm:$0xff] %v4363_v43 }
  0x65   : > { %3533 = vmatmul.msk.f32.gmra.mxu3 %vm223_vm1, %v4090_v24 }
  0x66   : > { %3599 = vmatmul.msk.f32.gmra.mxu0 %vm223_vm1, %v4194_v48 }
  0x6b   : > { %3434 = vmatmul.msk.f32.gmra.mxu1 %vm223_vm1, %v3564_v46 }
  0x6c   : > { %3468 = vmatmul.msk.f32.gmra.mxu2 %vm223_vm1, %v4204_v49 }
  0x6d   : > { %3534 = vmatmul.msk.f32.gmra.mxu3 %vm223_vm1, %v4122_v31 }
  0x6e   : > { %3600 = vmatmul.msk.f32.gmra.mxu0 %vm223_vm1, %v4207_v50 }
  0x73   : > { %3435 = vmatmul.msk.f32.gmra.mxu1 %vm223_vm1, %v4194_v48 }
  0x74   : > { %3469 = vmatmul.msk.f32.gmra.mxu2 %vm223_vm1, %v4217_v51 }
  0x75   : > { %3535 = vmatmul.msk.f32.gmra.mxu3 %vm223_vm1, %v4146_v36 }
  0x76   : > { %3601 = vmatmul.msk.f32.gmra.mxu0 %vm223_vm1, %v4220_v52 }
  0x7b   : > { %3436 = vmatmul.msk.f32.gmra.mxu1 %vm223_vm1, %v4207_v50 }
  0x7c   : > { %3470 = vmatmul.msk.f32.gmra.mxu2 %vm223_vm1, %v4231_v53 }
  0x7d   : > { %3536 = vmatmul.msk.f32.gmra.mxu3 %vm223_vm1, %v4166_v40 }
  0x7e   : > { %3602 = vmatmul.msk.f32.gmra.mxu0 %vm223_vm1, %v4234_v54 }
  0x83   : > { %3437 = vmatmul.msk.f32.gmra.mxu1 %vm223_vm1, %v4220_v52 }
  0x84   : > { %3471 = vmatmul.msk.f32.gmra.mxu2 %vm223_vm1, %v4245_v55 }
  0x85   : > { %3537 = vmatmul.msk.f32.gmra.mxu3 %vm223_vm1, %v4013_v5 }
  0x86   : > { %3603 = vmatmul.msk.f32.gmra.mxu0 %vm223_vm1, %v4248_v56 }
  0x8b   : > { %3438 = vmatmul.msk.f32.gmra.mxu1 %vm223_vm1, %v4234_v54 }
  0x8c   : > { %3472 = vmatmul.msk.f32.gmra.mxu2 %vm223_vm1, %v4259_v57 }
  0x8d   : > { %3538 = vmatmul.msk.f32.gmra.mxu3 %vm223_vm1, %v4030_v9 }
  0x8e   : > { %3604 = vmatmul.msk.f32.gmra.mxu0 %vm223_vm1, %v4262_v58 }
  0x90   : > { %v4272_v59 = vpop.f32.mrf.mxu1 }
  0x93   : > { %v4277_v61 = vpop.f32.mrf.mxu0  ;;  %3439 = vmatmul.msk.f32.gmra.mxu1 %vm223_vm1, %v4248_v56 }
  0x94   : > { %3473 = vmatmul.msk.f32.gmra.mxu2 %vm223_vm1, %v4275_v60 }
  0x95   : > { %3539 = vmatmul.msk.f32.gmra.mxu3 %vm223_vm1, %v4047_v13 }
  0x96   : > { %3605 = vmatmul.msk.f32.gmra.mxu0 %vm223_vm1, %v4280_v62 }
  0x97   : > { %v4290_v63 = vpop.f32.mrf.mxu2 }
  0x98   : > { %v4292_v0 = vpop.f32.mrf.mxu3  ;;  %v4294_v1 = vpop.f32.mrf.mxu1 }
  0x99   : > { %5139 = vst [vmem:[#allocation5_spill] sm:$0xff] %v4292_v0  ;;  %v4390_v0 = vld [vmem:[%s4010_s26 + $0xb1] sm:$0xff] }
  0x9a   : > { %5154 = vst [vmem:[#allocation20_spill] sm:$0xff] %v4390_v0 }
  0x9b   : > { %v4299_v3 = vpop.f32.mrf.mxu0  ;;  %3440 = vmatmul.msk.f32.gmra.mxu1 %vm223_vm1, %v4262_v58 }
  0x9c   : > { %3474 = vmatmul.msk.f32.gmra.mxu2 %vm223_vm1, %v4297_v2  ;;  %v4464_v2 = vld [vmem:[%s4010_s26 + $0xca] sm:$0xff] }
  0x9d   : > { %3540 = vmatmul.msk.f32.gmra.mxu3 %vm223_vm1, %v4064_v17 }
  0x9e   : > { %3606 = vmatmul.msk.f32.gmra.mxu0 %vm223_vm1, %v4302_v4 }
  0x9f   : > { %v4312_v5 = vpop.f32.mrf.mxu2 }
  0xa0   : > { %v4314_v8 = vpop.f32.mrf.mxu3  ;;  %v4316_v9 = vpop.f32.mrf.mxu1 }
  0xa1   : > { %5142 = vst [vmem:[#allocation8_spill] sm:$0xff] %v4314_v8 }
  0xa3   : > { %v4321_v13 = vpop.f32.mrf.mxu0  ;;  %3441 = vmatmul.msk.f32.gmra.mxu1 %vm223_vm1, %v4280_v62 }
  0xa4   : > { %3475 = vmatmul.msk.f32.gmra.mxu2 %vm223_vm1, %v4319_v12  ;;  %v4434_v12 = vld [vmem:[%s4010_s26 + $0xc9] sm:$0xff] }
  0xa5   : > { %3541 = vmatmul.msk.f32.gmra.mxu3 %vm223_vm1, %v4081_v21 }
  0xa6   : > { %3607 = vmatmul.msk.f32.gmra.mxu0 %vm223_vm1, %v4324_v16 }
  0xa7   : > { %v4334_v17 = vpop.f32.mrf.mxu2 }
  0xa8   : > { %v4336_v20 = vpop.f32.mrf.mxu3  ;;  %v4338_v25 = vpop.f32.mrf.mxu1 }
  0xa9   : > { %5145 = vst [vmem:[#allocation11_spill] sm:$0xff] %v4336_v20  ;;  %v4385_v20 = vld [vmem:[%s4010_s26 + $0x9a] sm:$0xff] }
  0xaa   : > { %5153 = vst [vmem:[#allocation19_spill] sm:$0xff] %v4385_v20 }
  0xab   : > { %v4343_v27 = vpop.f32.mrf.mxu0  ;;  %3442 = vmatmul.msk.f32.gmra.mxu1 %vm223_vm1, %v4302_v4  ;;  %v4429_v4 = vld [vmem:[%s4010_s26 + $0xb2] sm:$0xff] }
  0xac   : > { %3476 = vmatmul.msk.f32.gmra.mxu2 %vm223_vm1, %v4341_v26  ;;  %v4412_v26 = vld [vmem:[%s4010_s26 + $0xc1] sm:$0xff]  ;;  %5161 = vst [vmem:[#allocation27_spill] sm:$0xff] %v4429_v4 }
  0xad   : > { %3542 = vmatmul.msk.f32.gmra.mxu3 %vm223_vm1, %v4113_v28  ;;  %5158 = vst [vmem:[#allocation24_spill] sm:$0xff] %v4412_v26 }
  0xae   : > { %3608 = vmatmul.msk.f32.gmra.mxu0 %vm223_vm1, %v4346_v32 }
  0xaf   : > { %v4356_v21 = vpop.f32.mrf.mxu2 }
  0xb0   : > { %v4358_v41 = vpop.f32.mrf.mxu3  ;;  %v4360_v42 = vpop.f32.mrf.mxu1 }
  0xb1   : > { %5148 = vst [vmem:[#allocation14_spill] sm:$0xff] %v4358_v41 }
  0xb3   : > { %v4365_v44 = vpop.f32.mrf.mxu0  ;;  %3443 = vmatmul.msk.f32.gmra.mxu1 %vm223_vm1, %v4324_v16  ;;  %v4407_v16 = vld [vmem:[%s4010_s26 + $0xaa] sm:$0xff] }
  0xb4   : > { %3477 = vmatmul.msk.f32.gmra.mxu2 %vm223_vm1, %v4363_v43  ;;  %5157 = vst [vmem:[#allocation23_spill] sm:$0xff] %v4407_v16 }
  0xb5   : > { %3543 = vmatmul.msk.f32.gmra.mxu3 %vm223_vm1, %v4137_v33 }
  0xb6   : > { %3609 = vmatmul.msk.f32.gmra.mxu0 %vm223_vm1, %v4368_v45 }
  0xb7   : > { %v4378_v28 = vpop.f32.mrf.mxu2 }
  0xb8   : > { %5151 = vst [vmem:[#allocation17_spill] sm:$0xff] %v4378_v28  ;;  %v4380_v46 = vpop.f32.mrf.mxu3  ;;  %v4382_v41 = vpop.f32.mrf.mxu1  ;;  %v4467_v28 = vld [vmem:[%s4010_s26 + $0xe1] sm:$0xff] }
  0xb9   : > { %5152 = vst [vmem:[#allocation18_spill] sm:$0xff] %v4380_v46 }
  0xbb   : > { %v4387_v8 = vpop.f32.mrf.mxu0  ;;  %3444 = vmatmul.msk.f32.gmra.mxu1 %vm223_vm1, %v4346_v32 }
  0xbc   : > { %3478 = vmatmul.msk.f32.gmra.mxu2 %vm223_vm1, %v4385_v20 }
  0xbd   : > { %3544 = vmatmul.msk.f32.gmra.mxu3 %vm223_vm1, %v4157_v37 }
  0xbe   : > { %3610 = vmatmul.msk.f32.gmra.mxu0 %vm223_vm1, %v4390_v0 }
  0xbf   : > { %v4400_v33 = vpop.f32.mrf.mxu2 }
  0xc0   : > { %5155 = vst [vmem:[#allocation21_spill] sm:$0xff] %v4400_v33  ;;  %v4402_v46 = vpop.f32.mrf.mxu3  ;;  %v4404_v43 = vpop.f32.mrf.mxu1 }
  0xc1   : > { %5156 = vst [vmem:[#allocation22_spill] sm:$0xff] %v4402_v46 }
  0xc3   : > { %v4409_v32 = vpop.f32.mrf.mxu0  ;;  %3445 = vmatmul.msk.f32.gmra.mxu1 %vm223_vm1, %v4368_v45 }
  0xc4   : > { %3479 = vmatmul.msk.f32.gmra.mxu2 %vm223_vm1, %v4407_v16 }
  0xc5   : > { %3545 = vmatmul.msk.f32.gmra.mxu3 %vm223_vm1, %v4016_v6 }
  0xc6   : > { %3611 = vmatmul.msk.f32.gmra.mxu0 %vm223_vm1, %v4412_v26 }
  0xc7   : > { %v4422_v37 = vpop.f32.mrf.mxu2 }
  0xc8   : > { %5159 = vst [vmem:[#allocation25_spill] sm:$0xff] %v4422_v37  ;;  %v4424_v46 = vpop.f32.mrf.mxu3  ;;  %v4426_v20 = vpop.f32.mrf.mxu1  ;;  %v4449_v37 = vld [vmem:[%s4010_s26 + $0xc2] sm:$0xff] }
  0xc9   : > { %5160 = vst [vmem:[#allocation26_spill] sm:$0xff] %v4424_v46 }
  0xca   : > { %5164 = vst [vmem:[#allocation30_spill] sm:$0xff] %v4449_v37 }
  0xcb   : > { %v4431_v45 = vpop.f32.mrf.mxu0  ;;  %3446 = vmatmul.msk.f32.gmra.mxu1 %vm223_vm1, %v4390_v0  ;;  %v4452_v0 = vld [vmem:[%s4010_s26 + $0xd9] sm:$0xff] }
  0xcc   : > { %3480 = vmatmul.msk.f32.gmra.mxu2 %vm223_vm1, %v4429_v4 }
  0xcd   : > { %3546 = vmatmul.msk.f32.gmra.mxu3 %vm223_vm1, %v4033_v10 }
  0xce   : > { %3612 = vmatmul.msk.f32.gmra.mxu0 %vm223_vm1, %v4434_v12 }
  0xcf   : > { %v4444_v6 = vpop.f32.mrf.mxu2 }
  0xd0   : > { %5162 = vst [vmem:[#allocation28_spill] sm:$0xff] %v4444_v6  ;;  %v4446_v46 = vpop.f32.mrf.mxu3  ;;  %v619_v16 = vpop.f32.mrf.mxu1 }
  0xd1   : > { %5163 = vst [vmem:[#allocation29_spill] sm:$0xff] %v4446_v46  ;;  %v747_v10 = vadd.f32 %v619_v16, %v4277_v61 }
  0xd3   : > { %v1648_v62 = vpop.f32.mrf.mxu0  ;;  %3447 = vmatmul.msk.f32.gmra.mxu1 %vm223_vm1, %v4412_v26 }
  0xd4   : > { %3481 = vmatmul.msk.f32.gmra.mxu2 %vm223_vm1, %v4449_v37 }
  0xd5   : > { %3547 = vmatmul.msk.f32.gmra.mxu3 %vm223_vm1, %v4050_v14 }
  0xd6   : > { %3613 = vmatmul.msk.f32.gmra.mxu0 %vm223_vm1, %v4452_v0 }
  0xd7   : > { %v961_v46 = vpop.f32.mrf.mxu2 }
  0xd8   : > { %v1089_v4 = vadd.f32 %v961_v46, %v747_v10  ;;  %v1306_v6 = vpop.f32.mrf.mxu3  ;;  %v622_v33 = vpop.f32.mrf.mxu1  ;;  %v4484_v10 = vld [vmem:[%s4010_s26 + $0xf1] sm:$0xff] }
  0xd9   : > { %v748_v14 = vadd.f32 %v622_v33, %v4299_v3 }
  0xda   : > { %v1434_v58 = vadd.f32 %v1306_v6, %v1089_v4 }
  0xdb   : > { %v1651_v26 = vpop.f32.mrf.mxu0  ;;  %3448 = vmatmul.msk.f32.gmra.mxu1 %vm223_vm1, %v4434_v12 }
  0xdc   : > { %v4469_v37 = vadd.f32 %v1648_v62, %v1434_v58  ;;  %3482 = vmatmul.msk.f32.gmra.mxu2 %vm223_vm1, %v4464_v2  ;;  %v4481_v62 = vld [vmem:[%s4010_s26 + $0xda] sm:$0xff] }
  0xdd   : > { %3548 = vmatmul.msk.f32.gmra.mxu3 %vm223_vm1, %v4067_v18 }
  0xde   : > { %5165 = vst [vmem:[#allocation31_spill] sm:$0xff] %v4469_v37  ;;  %3614 = vmatmul.msk.f32.gmra.mxu0 %vm223_vm1, %v4467_v28 }
  0xdf   : > { %v964_v61 = vpop.f32.mrf.mxu2 }
  0xe0   : > { %v1090_v4 = vadd.f32 %v964_v61, %v748_v14  ;;  %v1309_v16 = vpop.f32.mrf.mxu3  ;;  %v625_v58 = vpop.f32.mrf.mxu1  ;;  %v4498_v61 = vld [vmem:[%s4010_s26 + $0xe2] sm:$0xff] }
  0xe1   : > { %v749_v18 = vadd.f32 %v625_v58, %v4321_v13 }
  0xe2   : > { %v1435_v46 = vadd.f32 %v1309_v16, %v1090_v4 }
  0xe3   : > { %v1654_v6 = vpop.f32.mrf.mxu0  ;;  %3449 = vmatmul.msk.f32.gmra.mxu1 %vm223_vm1, %v4452_v0 }
  0xe4   : > { %v4486_v37 = vadd.f32 %v1651_v26, %v1435_v46  ;;  %3483 = vmatmul.msk.f32.gmra.mxu2 %vm223_vm1, %v4481_v62  ;;  %v4501_v46 = vld [vmem:[%s4010_s26 + $0xf9] sm:$0xff] }
  0xe5   : > { %3549 = vmatmul.msk.f32.gmra.mxu3 %vm223_vm1, %v4084_v22 }
  0xe6   : > { %5166 = vst [vmem:[#allocation32_spill] sm:$0xff] %v4486_v37  ;;  %3615 = vmatmul.msk.f32.gmra.mxu0 %vm223_vm1, %v4484_v10 }
  0xe7   : > { %v967_v3 = vpop.f32.mrf.mxu2 }
  0xe8   : > { %v1091_v33 = vadd.f32 %v967_v3, %v749_v18  ;;  %v1312_v14 = vpop.f32.mrf.mxu3  ;;  %v628_v26 = vpop.f32.mrf.mxu1  ;;  %v4515_v3 = vld [vmem:[%s4010_s26 + $0xf2] sm:$0xff] }
  0xe9   : > { %v750_v22 = vadd.f32 %v628_v26, %v4343_v27 }
  0xea   : > { %v1436_v4 = vadd.f32 %v1312_v14, %v1091_v33 }
  0xeb   : > { %v1657_v16 = vpop.f32.mrf.mxu0  ;;  %3450 = vmatmul.msk.f32.gmra.mxu1 %vm223_vm1, %v4467_v28 }
  0xec   : > { %v4503_v37 = vadd.f32 %v1654_v6, %v1436_v4  ;;  %3484 = vmatmul.msk.f32.gmra.mxu2 %vm223_vm1, %v4498_v61  ;;  %v4518_v4 = vld [vmem:[%s4010_s26 + $0x109] sm:$0xff] }
  0xed   : > { %3550 = vmatmul.msk.f32.gmra.mxu3 %vm223_vm1, %v4116_v29 }
  0xee   : > { %5167 = vst [vmem:[#allocation33_spill] sm:$0xff] %v4503_v37  ;;  %3616 = vmatmul.msk.f32.gmra.mxu0 %vm223_vm1, %v4501_v46 }
  0xef   : > { %v970_v13 = vpop.f32.mrf.mxu2 }
  0xf0   : > { %v1092_v58 = vadd.f32 %v970_v13, %v750_v22  ;;  %v1315_v18 = vpop.f32.mrf.mxu3  ;;  %v631_v6 = vpop.f32.mrf.mxu1  ;;  %v4532_v13 = vld [vmem:[%s4010_s26 + $0xfa] sm:$0xff] }
  0xf1   : > { %v751_v29 = vadd.f32 %v631_v6, %v4365_v44 }
  0xf2   : > { %v1437_v33 = vadd.f32 %v1315_v18, %v1092_v58 }
  0xf3   : > { %v1660_v14 = vpop.f32.mrf.mxu0  ;;  %3451 = vmatmul.msk.f32.gmra.mxu1 %vm223_vm1, %v4484_v10 }
  0xf4   : > { %v4520_v37 = vadd.f32 %v1657_v16, %v1437_v33  ;;  %3485 = vmatmul.msk.f32.gmra.mxu2 %vm223_vm1, %v4515_v3  ;;  %v4535_v33 = vld [vmem:[%s4010_s26 + $0x111] sm:$0xff] }
  0xf5   : > { %3551 = vmatmul.msk.f32.gmra.mxu3 %vm223_vm1, %v4140_v34 }
  0xf6   : > { %5168 = vst [vmem:[#allocation34_spill] sm:$0xff] %v4520_v37  ;;  %3617 = vmatmul.msk.f32.gmra.mxu0 %vm223_vm1, %v4518_v4 }
  0xf7   : > { %v973_v27 = vpop.f32.mrf.mxu2 }
  0xf8   : > { %v1093_v26 = vadd.f32 %v973_v27, %v751_v29  ;;  %v1318_v22 = vpop.f32.mrf.mxu3  ;;  %v634_v16 = vpop.f32.mrf.mxu1  ;;  %v4549_v27 = vld [vmem:[%s4010_s26 + $0x10a] sm:$0xff] }
  0xf9   : > { %v752_v34 = vadd.f32 %v634_v16, %v4387_v8 }
  0xfa   : > { %v1438_v58 = vadd.f32 %v1318_v22, %v1093_v26 }
  0xfb   : > { %v1663_v18 = vpop.f32.mrf.mxu0  ;;  %3452 = vmatmul.msk.f32.gmra.mxu1 %vm223_vm1, %v4501_v46 }
  0xfc   : > { %v4537_v37 = vadd.f32 %v1660_v14, %v1438_v58  ;;  %3486 = vmatmul.msk.f32.gmra.mxu2 %vm223_vm1, %v4532_v13  ;;  %v4552_v58 = vld [vmem:[%s4010_s26 + $0x121] sm:$0xff] }
  0xfd   : > { %3552 = vmatmul.msk.f32.gmra.mxu3 %vm223_vm1, %v4160_v38 }
  0xfe   : > { %5169 = vst [vmem:[#allocation35_spill] sm:$0xff] %v4537_v37  ;;  %3618 = vmatmul.msk.f32.gmra.mxu0 %vm223_vm1, %v4535_v33 }
  0xff   : > { %v976_v44 = vpop.f32.mrf.mxu2 }
 0x100   : > { %v1094_v6 = vadd.f32 %v976_v44, %v752_v34  ;;  %v1321_v29 = vpop.f32.mrf.mxu3  ;;  %v637_v14 = vpop.f32.mrf.mxu1  ;;  %v4566_v44 = vld [vmem:[%s4010_s26 + $0x112] sm:$0xff] }
 0x101   : > { %v753_v38 = vadd.f32 %v637_v14, %v4409_v32 }
 0x102   : > { %v1439_v26 = vadd.f32 %v1321_v29, %v1094_v6 }
 0x103   : > { %v1666_v22 = vpop.f32.mrf.mxu0  ;;  %3453 = vmatmul.msk.f32.gmra.mxu1 %vm223_vm1, %v4518_v4 }
 0x104   : > { %v4554_v37 = vadd.f32 %v1663_v18, %v1439_v26  ;;  %3487 = vmatmul.msk.f32.gmra.mxu2 %vm223_vm1, %v4549_v27  ;;  %v4569_v26 = vld [vmem:[%s4010_s26 + $0x129] sm:$0xff] }
 0x105   : > { %3553 = vmatmul.msk.f32.gmra.mxu3 %vm223_vm1, %v4019_v7 }
 0x106   : > { %5170 = vst [vmem:[#allocation36_spill] sm:$0xff] %v4554_v37  ;;  %3619 = vmatmul.msk.f32.gmra.mxu0 %vm223_vm1, %v4552_v58 }
 0x107   : > { %v979_v8 = vpop.f32.mrf.mxu2 }
 0x108   : > { %v1095_v16 = vadd.f32 %v979_v8, %v753_v38  ;;  %v1324_v34 = vpop.f32.mrf.mxu3  ;;  %v640_v18 = vpop.f32.mrf.mxu1  ;;  %v4583_v8 = vld [vmem:[%s4010_s26 + $0x122] sm:$0xff] }
 0x109   : > { %v754_v7 = vadd.f32 %v640_v18, %v4431_v45 }
 0x10a   : > { %v1440_v6 = vadd.f32 %v1324_v34, %v1095_v16 }
 0x10b   : > { %v1669_v29 = vpop.f32.mrf.mxu0  ;;  %3454 = vmatmul.msk.f32.gmra.mxu1 %vm223_vm1, %v4535_v33 }
 0x10c   : > { %v4571_v37 = vadd.f32 %v1666_v22, %v1440_v6  ;;  %3488 = vmatmul.msk.f32.gmra.mxu2 %vm223_vm1, %v4566_v44  ;;  %v4586_v6 = vld [vmem:[%s4010_s26 + $0x139] sm:$0xff] }
 0x10d   : > { %3554 = vmatmul.msk.f32.gmra.mxu3 %vm223_vm1, %v4036_v11 }
 0x10e   : > { %5171 = vst [vmem:[#allocation37_spill] sm:$0xff] %v4571_v37  ;;  %3620 = vmatmul.msk.f32.gmra.mxu0 %vm223_vm1, %v4569_v26 }
 0x10f   : > { %v982_v32 = vpop.f32.mrf.mxu2 }
 0x110   : > { %v1096_v14 = vadd.f32 %v982_v32, %v754_v7  ;;  %v1327_v38 = vpop.f32.mrf.mxu3  ;;  %v643_v22 = vpop.f32.mrf.mxu1  ;;  %v4600_v32 = vld [vmem:[%s4010_s26 + $0x12a] sm:$0xff] }
 0x111   : > { %v755_v11 = vadd.f32 %v643_v22, %v4272_v59 }
 0x112   : > { %v1441_v16 = vadd.f32 %v1327_v38, %v1096_v14 }
 0x113   : > { %v1672_v34 = vpop.f32.mrf.mxu0  ;;  %3455 = vmatmul.msk.f32.gmra.mxu1 %vm223_vm1, %v4552_v58 }
 0x114   : > { %v4588_v37 = vadd.f32 %v1669_v29, %v1441_v16  ;;  %3489 = vmatmul.msk.f32.gmra.mxu2 %vm223_vm1, %v4583_v8  ;;  %v4603_v16 = vld [vmem:[%s4010_s26 + $0x141] sm:$0xff] }
 0x115   : > { %3555 = vmatmul.msk.f32.gmra.mxu3 %vm223_vm1, %v4053_v15 }
 0x116   : > { %5172 = vst [vmem:[#allocation38_spill] sm:$0xff] %v4588_v37  ;;  %3621 = vmatmul.msk.f32.gmra.mxu0 %vm223_vm1, %v4586_v6 }
 0x117   : > { %v985_v45 = vpop.f32.mrf.mxu2 }
 0x118   : > { %v1097_v18 = vadd.f32 %v985_v45, %v755_v11  ;;  %v1330_v7 = vpop.f32.mrf.mxu3  ;;  %v646_v29 = vpop.f32.mrf.mxu1  ;;  %v4617_v45 = vld [vmem:[%s4010_s26 + $0x13a] sm:$0xff] }
 0x119   : > { %v756_v15 = vadd.f32 %v646_v29, %v4294_v1 }
 0x11a   : > { %v1442_v14 = vadd.f32 %v1330_v7, %v1097_v18 }
 0x11b   : > { %v1675_v38 = vpop.f32.mrf.mxu0  ;;  %3456 = vmatmul.msk.f32.gmra.mxu1 %vm223_vm1, %v4569_v26 }
 0x11c   : > { %v4605_v37 = vadd.f32 %v1672_v34, %v1442_v14  ;;  %3490 = vmatmul.msk.f32.gmra.mxu2 %vm223_vm1, %v4600_v32  ;;  %v4620_v14 = vld [vmem:[%s4010_s26 + $0x151] sm:$0xff] }
 0x11d   : > { %3556 = vmatmul.msk.f32.gmra.mxu3 %vm223_vm1, %v4070_v19 }
 0x11e   : > { %5173 = vst [vmem:[#allocation39_spill] sm:$0xff] %v4605_v37  ;;  %3622 = vmatmul.msk.f32.gmra.mxu0 %vm223_vm1, %v4603_v16 }
 0x11f   : > { %v988_v59 = vpop.f32.mrf.mxu2 }
 0x120   : > { %v1098_v22 = vadd.f32 %v988_v59, %v756_v15  ;;  %v1333_v11 = vpop.f32.mrf.mxu3  ;;  %v649_v34 = vpop.f32.mrf.mxu1  ;;  %v4634_v59 = vld [vmem:[%s4010_s26 + $0x142] sm:$0xff] }
 0x121   : > { %v757_v19 = vadd.f32 %v649_v34, %v4316_v9 }
 0x122   : > { %v1443_v18 = vadd.f32 %v1333_v11, %v1098_v22 }
 0x123   : > { %v1678_v7 = vpop.f32.mrf.mxu0  ;;  %3457 = vmatmul.msk.f32.gmra.mxu1 %vm223_vm1, %v4586_v6 }
 0x124   : > { %v4622_v37 = vadd.f32 %v1675_v38, %v1443_v18  ;;  %3491 = vmatmul.msk.f32.gmra.mxu2 %vm223_vm1, %v4617_v45  ;;  %v4637_v18 = vld [vmem:[%s4010_s26 + $0x159] sm:$0xff] }
 0x125   : > { %3557 = vmatmul.msk.f32.gmra.mxu3 %vm223_vm1, %v4087_v23 }
 0x126   : > { %5174 = vst [vmem:[#allocation40_spill] sm:$0xff] %v4622_v37  ;;  %3623 = vmatmul.msk.f32.gmra.mxu0 %vm223_vm1, %v4620_v14 }
 0x127   : > { %v991_v1 = vpop.f32.mrf.mxu2 }
 0x128   : > { %v1099_v29 = vadd.f32 %v991_v1, %v757_v19  ;;  %v1336_v15 = vpop.f32.mrf.mxu3  ;;  %v652_v38 = vpop.f32.mrf.mxu1  ;;  %v4651_v1 = vld [vmem:[%s4010_s26 + $0x152] sm:$0xff] }
 0x129   : > { %v758_v23 = vadd.f32 %v652_v38, %v4338_v25 }
 0x12a   : > { %v1444_v22 = vadd.f32 %v1336_v15, %v1099_v29 }
 0x12b   : > { %v1681_v11 = vpop.f32.mrf.mxu0  ;;  %3458 = vmatmul.msk.f32.gmra.mxu1 %vm223_vm1, %v4603_v16 }
 0x12c   : > { %v4639_v37 = vadd.f32 %v1678_v7, %v1444_v22  ;;  %3492 = vmatmul.msk.f32.gmra.mxu2 %vm223_vm1, %v4634_v59  ;;  %v4654_v22 = vld [vmem:[%s4010_s26 + $0x169] sm:$0xff] }
 0x12d   : > { %3558 = vmatmul.msk.f32.gmra.mxu3 %vm223_vm1, %v4119_v30  ;;  %5176 = vst [vmem:[#allocation42_spill] sm:$0xff] %v4654_v22 }
 0x12e   : > { %5175 = vst [vmem:[#allocation41_spill] sm:$0xff] %v4639_v37  ;;  %3624 = vmatmul.msk.f32.gmra.mxu0 %vm223_vm1, %v4637_v18 }
 0x12f   : > { %v994_v9 = vpop.f32.mrf.mxu2 }
 0x130   : > { %v1100_v34 = vadd.f32 %v994_v9, %v758_v23  ;;  %v1339_v19 = vpop.f32.mrf.mxu3  ;;  %v655_v7 = vpop.f32.mrf.mxu1  ;;  %v4668_v9 = vld [vmem:[%s4010_s26 + $0x15a] sm:$0xff] }
 0x131   : > { %v759_v30 = vadd.f32 %v655_v7, %v4360_v42 }
 0x132   : > { %v1445_v29 = vadd.f32 %v1339_v19, %v1100_v34 }
 0x133   : > { %v1684_v15 = vpop.f32.mrf.mxu0  ;;  %3459 = vmatmul.msk.f32.gmra.mxu1 %vm223_vm1, %v4620_v14 }
 0x134   : > { %v4656_v37 = vadd.f32 %v1681_v11, %v1445_v29  ;;  %3493 = vmatmul.msk.f32.gmra.mxu2 %vm223_vm1, %v4651_v1  ;;  %v4671_v29 = vld [vmem:[%s4010_s26 + $0x171] sm:$0xff] }
 0x135   : > { %3559 = vmatmul.msk.f32.gmra.mxu3 %vm223_vm1, %v4143_v35 }
 0x136   : > { %5177 = vst [vmem:[#allocation43_spill] sm:$0xff] %v4656_v37  ;;  %3625 = vmatmul.msk.f32.gmra.mxu0 %vm223_vm1, %v4654_v22 }
 0x137   : > { %v997_v25 = vpop.f32.mrf.mxu2 }
 0x138   : > { %v1101_v38 = vadd.f32 %v997_v25, %v759_v30  ;;  %v1342_v23 = vpop.f32.mrf.mxu3  ;;  %v658_v11 = vpop.f32.mrf.mxu1 }
 0x139   : > { %v760_v35 = vadd.f32 %v658_v11, %v4382_v41 }
 0x13a   : > { %v1446_v34 = vadd.f32 %v1342_v23, %v1101_v38  ;;  %v4688_v23 = vld [vmem:[%s4010_s26 + $0x180] sm:$0xff] }
 0x13b   : > { %v1687_v19 = vpop.f32.mrf.mxu0  ;;  %3460 = vmatmul.msk.f32.gmra.mxu1 %vm223_vm1, %v4637_v18 }
 0x13c   : > { %v4673_v37 = vadd.f32 %v1684_v15, %v1446_v34  ;;  %3494 = vmatmul.msk.f32.gmra.mxu2 %vm223_vm1, %v4668_v9  ;;  %v4685_v15 = vld [vmem:[%s4010_s26 + $0x16a] sm:$0xff] }
 0x13d   : > { %3560 = vmatmul.msk.f32.gmra.mxu3 %vm223_vm1, %v4163_v39  ;;  %5179 = vst [vmem:[#allocation45_spill] sm:$0xff] %v4685_v15 }
 0x13e   : > { %5178 = vst [vmem:[#allocation44_spill] sm:$0xff] %v4673_v37  ;;  %3626 = vmatmul.msk.f32.gmra.mxu0 %vm223_vm1, %v4671_v29  ;;  %v4691_v37 = vld [vmem:[%s4010_s26 + $0x181] sm:$0xff] }
 0x13f   : > { %v1000_v42 = vpop.f32.mrf.mxu2 }
 0x140   : > { %v1102_v7 = vadd.f32 %v1000_v42, %v760_v35  ;;  %v1345_v30 = vpop.f32.mrf.mxu3  ;;  %v661_v25 = vpop.f32.mrf.mxu1 }
 0x141   : > { %v761_v41 = vadd.f32 %v661_v25, %v4404_v43 }
 0x142   : > { %v1447_v38 = vadd.f32 %v1345_v30, %v1102_v7 }
 0x143   : > { %v1690_v34 = vpop.f32.mrf.mxu0  ;;  %3461 = vmatmul.msk.f32.gmra.mxu1 %vm223_vm1, %v4654_v22  ;;  %v4711_v22 = vld [vmem:[%s4010_s26 + $0x189] sm:$0xff] }
 0x144   : > { %v4693_v39 = vadd.f32 %v1687_v19, %v1447_v38  ;;  %3495 = vmatmul.msk.f32.gmra.mxu2 %vm223_vm1, %v4685_v15  ;;  %v4705_v19 = vld [vmem:[%s4010_s26 + $0x172] sm:$0xff]  ;;  %v4708_v38 = vld [vmem:[%s4010_s26 + $0x188] sm:$0xff] }
 0x145   : > { %3561 = vmatmul.msk.f32.gmra.mxu3 %vm223_vm1, %v4688_v23 }
 0x146   : > { %5180 = vst [vmem:[#allocation46_spill] sm:$0xff] %v4693_v39  ;;  %3627 = vmatmul.msk.f32.gmra.mxu0 %vm223_vm1, %v4691_v37 }
 0x147   : > { %v1003_v11 = vpop.f32.mrf.mxu2 }
 0x148   : > { %v1103_v35 = vadd.f32 %v1003_v11, %v761_v41  ;;  %v1348_v42 = vpop.f32.mrf.mxu3  ;;  %v664_v7 = vpop.f32.mrf.mxu1 }
 0x149   : > { %v762_v43 = vadd.f32 %v664_v7, %v4426_v20 }
 0x14a   : > { %v1448_v30 = vadd.f32 %v1348_v42, %v1103_v35 }
 0x14b   : > { %v1693_v39 = vpop.f32.mrf.mxu0  ;;  %3462 = vmatmul.msk.f32.gmra.mxu1 %vm223_vm1, %v4671_v29 }
 0x14c   : > { %v4713_v15 = vadd.f32 %v1690_v34, %v1448_v30  ;;  %3496 = vmatmul.msk.f32.gmra.mxu2 %vm223_vm1, %v4705_v19 }
 0x14d   : > { %3562 = vmatmul.msk.f32.gmra.mxu3 %vm223_vm1, %v4708_v38 }
 0x14e   : > { %3628 = vmatmul.msk.f32.gmra.mxu0 %vm223_vm1, %v4711_v22 }
 0x14f   : > { %v1006_v25 = vpop.f32.mrf.mxu2 }
 0x150   : > { %v1104_v41 = vadd.f32 %v1006_v25, %v762_v43  ;;  %v1351_v11 = vpop.f32.mrf.mxu3  ;;  %v667_v35 = vpop.f32.mrf.mxu1 }
 0x151   : > { %v763_v20 = vadd.f32 %v667_v35, %v4290_v63 }
 0x152   : > { %v1449_v34 = vadd.f32 %v1351_v11, %v1104_v41 }
 0x153   : > { %v1696_v42 = vpop.f32.mrf.mxu0  ;;  %3663 = vmatmul.msk.f32.vlgmr.msra.gmra.mxu1 %vm223_vm1, %v4191_v47 }
 0x154   : > { %v4724_v30 = vadd.f32 %v1693_v39, %v1449_v34  ;;  %3729 = vmatmul.msk.f32.vlgmr.msra.gmra.mxu2 %vm223_vm1, %v4090_v24 }
 0x155   : > { %3795 = vmatmul.msk.f32.vlgmr.msra.gmra.mxu3 %vm223_vm1, %v4194_v48 }
 0x156   : > { %3861 = vmatmul.msk.f32.vlgmr.msra.gmra.mxu0 %vm223_vm1, %v4217_v51 }
 0x157   : > { %v1009_v7 = vpop.f32.mrf.mxu2 }
 0x158   : > { %v1105_v43 = vadd.f32 %v1009_v7, %v763_v20  ;;  %v1354_v25 = vpop.f32.mrf.mxu3  ;;  %v670_v41 = vpop.f32.mrf.mxu1 }
 0x159   : > { %v764_v24 = vadd.f32 %v670_v41, %v4312_v5 }
 0x15a   : > { %v1450_v39 = vadd.f32 %v1354_v25, %v1105_v43 }
 0x15b   : > { %v1699_v11 = vpop.f32.mrf.mxu0  ;;  %3664 = vmatmul.msk.f32.gmra.mxu1 %vm223_vm1, %v4204_v49 }
 0x15c   : > { %v4735_v34 = vadd.f32 %v1696_v42, %v1450_v39  ;;  %3730 = vmatmul.msk.f32.gmra.mxu2 %vm223_vm1, %v4122_v31 }
 0x15d   : > { %3796 = vmatmul.msk.f32.gmra.mxu3 %vm223_vm1, %v4207_v50 }
 0x15e   : > { %3862 = vmatmul.msk.f32.gmra.mxu0 %vm223_vm1, %v4231_v53 }
 0x15f   : > { %v1012_v47 = vpop.f32.mrf.mxu2 }
 0x160   : > { %v1106_v48 = vadd.f32 %v1012_v47, %v764_v24  ;;  %v1357_v63 = vpop.f32.mrf.mxu3  ;;  %v673_v35 = vpop.f32.mrf.mxu1  ;;  %v3699_v24 = vld [vmem:[%s4010_s26 + $0x60] sm:$0xff] }
 0x161   : > { %v765_v31 = vadd.f32 %v673_v35, %v4334_v17 }
 0x162   : > { %v1451_v42 = vadd.f32 %v1357_v63, %v1106_v48 }
 0x163   : > { %v1702_v20 = vpop.f32.mrf.mxu0  ;;  %3665 = vmatmul.msk.f32.gmra.mxu1 %vm223_vm1, %v4217_v51 }
 0x164   : > { %v4746_v7 = vadd.f32 %v1699_v11, %v1451_v42  ;;  %3731 = vmatmul.msk.f32.gmra.mxu2 %vm223_vm1, %v4146_v36 }
 0x165   : > { %3797 = vmatmul.msk.f32.gmra.mxu3 %vm223_vm1, %v4220_v52 }
 0x166   : > { %3863 = vmatmul.msk.f32.gmra.mxu0 %vm223_vm1, %v4245_v55 }
 0x167   : > { %v1015_v49 = vpop.f32.mrf.mxu2 }
 0x168   : > { %v1107_v50 = vadd.f32 %v1015_v49, %v765_v31  ;;  %v1360_v5 = vpop.f32.mrf.mxu3  ;;  %v676_v43 = vpop.f32.mrf.mxu1 }
 0x169   : > { %v766_v36 = vadd.f32 %v676_v43, %v4356_v21 }
 0x16a   : > { %v1452_v25 = vadd.f32 %v1360_v5, %v1107_v50  ;;  %v5184_v5 = vld [vmem:[#allocation21_spill] sm:$0xff] }
 0x16b   : > { %v1705_v41 = vpop.f32.mrf.mxu0  ;;  %3666 = vmatmul.msk.f32.gmra.mxu1 %vm223_vm1, %v4231_v53 }
 0x16c   : > { %v4757_v39 = vadd.f32 %v1702_v20, %v1452_v25  ;;  %3732 = vmatmul.msk.f32.gmra.mxu2 %vm223_vm1, %v4166_v40  ;;  %v5181_v40 = vld [vmem:[#allocation17_spill] sm:$0xff]  ;;  %v3700_v20 = vld [vmem:[%s4010_s26 + $0x68] sm:$0xff] }
 0x16d   : > { %3798 = vmatmul.msk.f32.gmra.mxu3 %vm223_vm1, %v4234_v54 }
 0x16e   : > { %3864 = vmatmul.msk.f32.gmra.mxu0 %vm223_vm1, %v4259_v57 }
 0x16f   : > { %v1018_v51 = vpop.f32.mrf.mxu2 }
 0x170   : > { %v1108_v52 = vadd.f32 %v1018_v51, %v766_v36  ;;  %v1363_v17 = vpop.f32.mrf.mxu3  ;;  %v679_v11 = vpop.f32.mrf.mxu1 }
 0x171   : > { %v767_v54 = vadd.f32 %v679_v11, %v5181_v40 }
 0x172   : > { %v1453_v47 = vadd.f32 %v1363_v17, %v1108_v52  ;;  %v3701_v52 = vld [vmem:[%s4010_s26 + $0x78] sm:$0xff] }
 0x173   : > { %v1708_v48 = vpop.f32.mrf.mxu0  ;;  %3667 = vmatmul.msk.f32.gmra.mxu1 %vm223_vm1, %v4245_v55  ;;  %v5182_v55 = vld [vmem:[#allocation3_spill] sm:$0xff] }
 0x174   : > { %v4769_v53 = vadd.f32 %v1705_v41, %v1453_v47  ;;  %3733 = vmatmul.msk.f32.gmra.mxu2 %vm223_vm1, %v3699_v24  ;;  %v5186_v47 = vld [vmem:[#allocation9_spill] sm:$0xff] }
 0x175   : > { %3799 = vmatmul.msk.f32.gmra.mxu3 %vm223_vm1, %v4248_v56  ;;  %v5183_v56 = vld [vmem:[#allocation6_spill] sm:$0xff] }
 0x176   : > { %3865 = vmatmul.msk.f32.gmra.mxu0 %vm223_vm1, %v4275_v60 }
 0x177   : > { %v1021_v21 = vpop.f32.mrf.mxu2 }
 0x178   : > { %v1109_v63 = vadd.f32 %v1021_v21, %v767_v54  ;;  %v1366_v35 = vpop.f32.mrf.mxu3  ;;  %v682_v42 = vpop.f32.mrf.mxu1 }
 0x179   : > { %v768_v43 = vadd.f32 %v682_v42, %v5184_v5  ;;  %v3702_v42 = vld [vmem:[%s4010_s26 + $0x80] sm:$0xff]  ;;  %v5190_v5 = vld [vmem:[#allocation28_spill] sm:$0xff] }
 0x17a   : > { %v1454_v31 = vadd.f32 %v1366_v35, %v1109_v63 }
 0x17b   : > { %v1711_v49 = vpop.f32.mrf.mxu0  ;;  %3668 = vmatmul.msk.f32.gmra.mxu1 %vm223_vm1, %v4259_v57  ;;  %v5185_v57 = vld [vmem:[#allocation4_spill] sm:$0xff] }
 0x17c   : > { %v4780_v50 = vadd.f32 %v1708_v48, %v1454_v31  ;;  %3734 = vmatmul.msk.f32.gmra.mxu2 %vm223_vm1, %v3700_v20  ;;  %v5187_v48 = vld [vmem:[#allocation25_spill] sm:$0xff] }
 0x17d   : > { %3800 = vmatmul.msk.f32.gmra.mxu3 %vm223_vm1, %v5182_v55  ;;  %v5189_v55 = vld [vmem:[#allocation12_spill] sm:$0xff] }
 0x17e   : > { %3866 = vmatmul.msk.f32.gmra.mxu0 %vm223_vm1, %v5183_v56 }
 0x17f   : > { %v1024_v25 = vpop.f32.mrf.mxu2 }
 0x180   : > { %v1110_v41 = vadd.f32 %v1024_v25, %v768_v43  ;;  %v1369_v36 = vpop.f32.mrf.mxu3  ;;  %v685_v51 = vpop.f32.mrf.mxu1 }
 0x181   : > { %v769_v40 = vadd.f32 %v685_v51, %v5187_v48  ;;  %v5192_v48 = vld [vmem:[#allocation15_spill] sm:$0xff] }
 0x182   : > { %v1455_v17 = vadd.f32 %v1369_v36, %v1110_v41 }
 0x183   : > { %v1714_v11 = vpop.f32.mrf.mxu0  ;;  %3669 = vmatmul.msk.f32.gmra.mxu1 %vm223_vm1, %v4275_v60  ;;  %v5188_v60 = vld [vmem:[#allocation7_spill] sm:$0xff] }
 0x184   : > { %v4791_v24 = vadd.f32 %v1711_v49, %v1455_v17  ;;  %3735 = vmatmul.msk.f32.gmra.mxu2 %vm223_vm1, %v3701_v52  ;;  %v3703_v52 = vld [vmem:[%s4010_s26 + $0x90] sm:$0xff] }
 0x185   : > { %3801 = vmatmul.msk.f32.gmra.mxu3 %vm223_vm1, %v5185_v57 }
 0x186   : > { %3867 = vmatmul.msk.f32.gmra.mxu0 %vm223_vm1, %v5186_v47 }
 0x187   : > { %v1027_v54 = vpop.f32.mrf.mxu2 }
 0x188   : > { %v1111_v21 = vadd.f32 %v1027_v54, %v769_v40  ;;  %v1372_v63 = vpop.f32.mrf.mxu3  ;;  %v688_v35 = vpop.f32.mrf.mxu1  ;;  %v5193_v40 = vld [vmem:[#allocation5_spill] sm:$0xff] }
 0x189   : > { %v770_v43 = vadd.f32 %v688_v35, %v5190_v5 }
 0x18a   : > { %v1456_v20 = vadd.f32 %v1372_v63, %v1111_v21 }
 0x18b   : > { %v1717_v31 = vpop.f32.mrf.mxu0  ;;  %3670 = vmatmul.msk.f32.gmra.mxu1 %vm223_vm1, %v5183_v56  ;;  %v5191_v56 = vld [vmem:[#allocation10_spill] sm:$0xff] }
 0x18c   : > { %v4802_v49 = vadd.f32 %v1714_v11, %v1456_v20  ;;  %3736 = vmatmul.msk.f32.gmra.mxu2 %vm223_vm1, %v3702_v42  ;;  %v3704_v20 = vld [vmem:[%s4010_s26 + $0x98] sm:$0xff] }
 0x18d   : > { %3802 = vmatmul.msk.f32.gmra.mxu3 %vm223_vm1, %v5188_v60 }
 0x18e   : > { %3868 = vmatmul.msk.f32.gmra.mxu0 %vm223_vm1, %v5189_v55 }
 0x18f   : > { %v1030_v25 = vpop.f32.mrf.mxu2 }
 0x190   : > { %v1112_v41 = vadd.f32 %v1030_v25, %v770_v43  ;;  %v1375_v36 = vpop.f32.mrf.mxu3  ;;  %v691_v51 = vpop.f32.mrf.mxu1  ;;  %v5195_v43 = vld [vmem:[#allocation19_spill] sm:$0xff]  ;;  %v5196_v25 = vld [vmem:[#allocation8_spill] sm:$0xff] }
 0x191   : > { %v771_v54 = vadd.f32 %v691_v51, %v5193_v40 }
 0x192   : > { %v1457_v17 = vadd.f32 %v1375_v36, %v1112_v41 }
 0x193   : > { %v1720_v11 = vpop.f32.mrf.mxu0  ;;  %3671 = vmatmul.msk.f32.gmra.mxu1 %vm223_vm1, %v5186_v47  ;;  %v5194_v47 = vld [vmem:[#allocation13_spill] sm:$0xff] }
 0x194   : > { %v4813_v57 = vadd.f32 %v1717_v31, %v1457_v17  ;;  %3737 = vmatmul.msk.f32.gmra.mxu2 %vm223_vm1, %v3703_v52 }
 0x195   : > { %3803 = vmatmul.msk.f32.gmra.mxu3 %vm223_vm1, %v5191_v56 }
 0x196   : > { %3869 = vmatmul.msk.f32.gmra.mxu0 %vm223_vm1, %v5192_v48 }
 0x197   : > { %v1033_v21 = vpop.f32.mrf.mxu2 }
 0x198   : > { %v1113_v63 = vadd.f32 %v1033_v21, %v771_v54  ;;  %v1378_v35 = vpop.f32.mrf.mxu3  ;;  %v694_v42 = vpop.f32.mrf.mxu1  ;;  %v5198_v21 = vld [vmem:[#allocation23_spill] sm:$0xff] }
 0x199   : > { %v772_v41 = vadd.f32 %v694_v42, %v5196_v25 }
 0x19a   : > { %v1458_v31 = vadd.f32 %v1378_v35, %v1113_v63  ;;  %v5199_v63 = vld [vmem:[#allocation11_spill] sm:$0xff] }
 0x19b   : > { %v1723_v60 = vpop.f32.mrf.mxu0  ;;  %3672 = vmatmul.msk.f32.gmra.mxu1 %vm223_vm1, %v5189_v55  ;;  %v5197_v55 = vld [vmem:[#allocation16_spill] sm:$0xff] }
 0x19c   : > { %v4824_v5 = vadd.f32 %v1720_v11, %v1458_v31  ;;  %3738 = vmatmul.msk.f32.gmra.mxu2 %vm223_vm1, %v3704_v20  ;;  %v3705_v11 = vld [vmem:[%s4010_s26 + $0xa8] sm:$0xff] }
 0x19d   : > { %3804 = vmatmul.msk.f32.gmra.mxu3 %vm223_vm1, %v5194_v47 }
 0x19e   : > { %3870 = vmatmul.msk.f32.gmra.mxu0 %vm223_vm1, %v5195_v43 }
 0x19f   : > { %v1036_v36 = vpop.f32.mrf.mxu2 }
 0x1a0   : > { %v1114_v51 = vadd.f32 %v1036_v36, %v772_v41  ;;  %v1381_v52 = vpop.f32.mrf.mxu3  ;;  %v697_v17 = vpop.f32.mrf.mxu1 }
 0x1a1   : > { %v773_v35 = vadd.f32 %v697_v17, %v5199_v63 }
 0x1a2   : > { %v1459_v56 = vadd.f32 %v1381_v52, %v1114_v51  ;;  %v5201_v51 = vld [vmem:[#allocation27_spill] sm:$0xff]  ;;  %v5202_v52 = vld [vmem:[#allocation14_spill] sm:$0xff] }
 0x1a3   : > { %v1726_v40 = vpop.f32.mrf.mxu0  ;;  %3673 = vmatmul.msk.f32.gmra.mxu1 %vm223_vm1, %v5192_v48  ;;  %v5200_v48 = vld [vmem:[#allocation20_spill] sm:$0xff] }
 0x1a4   : > { %v4835_v54 = vadd.f32 %v1723_v60, %v1459_v56  ;;  %3739 = vmatmul.msk.f32.gmra.mxu2 %vm223_vm1, %v3705_v11  ;;  %v3706_v60 = vld [vmem:[%s4010_s26 + $0xb0] sm:$0xff] }
 0x1a5   : > { %3805 = vmatmul.msk.f32.gmra.mxu3 %vm223_vm1, %v5197_v55 }
 0x1a6   : > { %3871 = vmatmul.msk.f32.gmra.mxu0 %vm223_vm1, %v5198_v21 }
 0x1a7   : > { %v1039_v42 = vpop.f32.mrf.mxu2 }
 0x1a8   : > { %v1115_v20 = vadd.f32 %v1039_v42, %v773_v35  ;;  %v1384_v31 = vpop.f32.mrf.mxu3  ;;  %v700_v47 = vpop.f32.mrf.mxu1 }
 0x1a9   : > { %v774_v17 = vadd.f32 %v700_v47, %v5202_v52  ;;  %v5205_v47 = vld [vmem:[#allocation18_spill] sm:$0xff] }
 0x1aa   : > { %v1460_v25 = vadd.f32 %v1384_v31, %v1115_v20  ;;  %v5204_v31 = vld [vmem:[#allocation30_spill] sm:$0xff] }
 0x1ab   : > { %v1729_v41 = vpop.f32.mrf.mxu0  ;;  %3674 = vmatmul.msk.f32.gmra.mxu1 %vm223_vm1, %v5195_v43  ;;  %v5203_v43 = vld [vmem:[#allocation24_spill] sm:$0xff] }
 0x1ac   : > { %v4846_v36 = vadd.f32 %v1726_v40, %v1460_v25  ;;  %3740 = vmatmul.msk.f32.gmra.mxu2 %vm223_vm1, %v3706_v60  ;;  %v3707_v40 = vld [vmem:[%s4010_s26 + $0xc0] sm:$0xff] }
 0x1ad   : > { %3806 = vmatmul.msk.f32.gmra.mxu3 %vm223_vm1, %v5200_v48 }
 0x1ae   : > { %3872 = vmatmul.msk.f32.gmra.mxu0 %vm223_vm1, %v5201_v51 }
 0x1af   : > { %v1042_v11 = vpop.f32.mrf.mxu2 }
 0x1b0   : > { %v1116_v56 = vadd.f32 %v1042_v11, %v774_v17  ;;  %v1387_v55 = vpop.f32.mrf.mxu3  ;;  %v703_v63 = vpop.f32.mrf.mxu1 }
 0x1b1   : > { %v775_v60 = vadd.f32 %v703_v63, %v5205_v47 }
 0x1b2   : > { %v1461_v35 = vadd.f32 %v1387_v55, %v1116_v56 }
 0x1b3   : > { %v1732_v42 = vpop.f32.mrf.mxu0  ;;  %3675 = vmatmul.msk.f32.gmra.mxu1 %vm223_vm1, %v5198_v21  ;;  %v5206_v21 = vld [vmem:[#allocation22_spill] sm:$0xff] }
 0x1b4   : > { %v4857_v20 = vadd.f32 %v1729_v41, %v1461_v35  ;;  %3741 = vmatmul.msk.f32.gmra.mxu2 %vm223_vm1, %v3707_v40  ;;  %v3708_v41 = vld [vmem:[%s4010_s26 + $0xc8] sm:$0xff] }
 0x1b5   : > { %3807 = vmatmul.msk.f32.gmra.mxu3 %vm223_vm1, %v5203_v43 }
 0x1b6   : > { %3873 = vmatmul.msk.f32.gmra.mxu0 %vm223_vm1, %v5204_v31 }
 0x1b7   : > { %v1045_v25 = vpop.f32.mrf.mxu2 }
 0x1b8   : > { %v1117_v48 = vadd.f32 %v1045_v25, %v775_v60  ;;  %v1390_v52 = vpop.f32.mrf.mxu3  ;;  %v706_v17 = vpop.f32.mrf.mxu1 }
 0x1b9   : > { %v776_v63 = vadd.f32 %v706_v17, %v5206_v21 }
 0x1ba   : > { %v1462_v11 = vadd.f32 %v1390_v52, %v1117_v48 }
 0x1bb   : > { %v1735_v56 = vpop.f32.mrf.mxu0  ;;  %3676 = vmatmul.msk.f32.gmra.mxu1 %vm223_vm1, %v5201_v51 }
 0x1bc   : > { %v4868_v55 = vadd.f32 %v1732_v42, %v1462_v11  ;;  %3742 = vmatmul.msk.f32.gmra.mxu2 %vm223_vm1, %v3708_v41  ;;  %v3709_v42 = vld [vmem:[%s4010_s26 + $0xd8] sm:$0xff] }
 0x1bd   : > { %3808 = vmatmul.msk.f32.gmra.mxu3 %vm223_vm1, %v4434_v12  ;;  %v5207_v12 = vld [vmem:[#allocation26_spill] sm:$0xff] }
 0x1be   : > { %3874 = vmatmul.msk.f32.gmra.mxu0 %vm223_vm1, %v4464_v2 }
 0x1bf   : > { %v1048_v40 = vpop.f32.mrf.mxu2 }
 0x1c0   : > { %v1118_v35 = vadd.f32 %v1048_v40, %v776_v63  ;;  %v1393_v43 = vpop.f32.mrf.mxu3  ;;  %v709_v47 = vpop.f32.mrf.mxu1 }
 0x1c1   : > { %v777_v51 = vadd.f32 %v709_v47, %v5207_v12 }
 0x1c2   : > { %v1463_v60 = vadd.f32 %v1393_v43, %v1118_v35 }
 0x1c3   : > { %v1738_v25 = vpop.f32.mrf.mxu0  ;;  %3677 = vmatmul.msk.f32.gmra.mxu1 %vm223_vm1, %v5204_v31 }
 0x1c4   : > { %v4879_v48 = vadd.f32 %v1735_v56, %v1463_v60  ;;  %3743 = vmatmul.msk.f32.gmra.mxu2 %vm223_vm1, %v3709_v42  ;;  %v3710_v56 = vld [vmem:[%s4010_s26 + $0xe0] sm:$0xff]  ;;  %v3711_v60 = vld [vmem:[%s4010_s26 + $0xf0] sm:$0xff] }
 0x1c5   : > { %3809 = vmatmul.msk.f32.gmra.mxu3 %vm223_vm1, %v4452_v0  ;;  %v5208_v0 = vld [vmem:[#allocation29_spill] sm:$0xff] }
 0x1c6   : > { %3875 = vmatmul.msk.f32.gmra.mxu0 %vm223_vm1, %v4481_v62 }
 0x1c7   : > { %v1051_v52 = vpop.f32.mrf.mxu2 }
 0x1c8   : > { %v1119_v17 = vadd.f32 %v1051_v52, %v777_v51  ;;  %v1396_v41 = vpop.f32.mrf.mxu3  ;;  %v712_v11 = vpop.f32.mrf.mxu1 }
 0x1c9   : > { %v778_v31 = vadd.f32 %v712_v11, %v5208_v0 }
 0x1ca   : > { %v1464_v21 = vadd.f32 %v1396_v41, %v1119_v17 }
 0x1cb   : > { %v1741_v63 = vpop.f32.mrf.mxu0  ;;  %3678 = vmatmul.msk.f32.gmra.mxu1 %vm223_vm1, %v4464_v2 }
 0x1cc   : > { %v4890_v40 = vadd.f32 %v1738_v25, %v1464_v21  ;;  %3744 = vmatmul.msk.f32.gmra.mxu2 %vm223_vm1, %v3710_v56  ;;  %v3712_v56 = vld [vmem:[%s4010_s26 + $0xf8] sm:$0xff] }
 0x1cd   : > { %3810 = vmatmul.msk.f32.gmra.mxu3 %vm223_vm1, %v4467_v28  ;;  %v5209_v28 = vld [vmem:[#allocation31_spill] sm:$0xff] }
 0x1ce   : > { %3876 = vmatmul.msk.f32.gmra.mxu0 %vm223_vm1, %v4498_v61 }
 0x1cf   : > { %v1054_v35 = vpop.f32.mrf.mxu2 }
 0x1d0   : > { %v1120_v43 = vadd.f32 %v1054_v35, %v778_v31  ;;  %v1399_v47 = vpop.f32.mrf.mxu3  ;;  %v1990_v42 = vpop.f32.mrf.mxu1 }
 0x1d1   : > { %v2118_v51 = vadd.f32 %v1990_v42, %v5209_v28  ;;  %v3713_v42 = vld [vmem:[%s4010_s26 + $0x108] sm:$0xff] }
 0x1d2   : > { %v1465_v25 = vadd.f32 %v1399_v47, %v1120_v43 }
 0x1d3   : > { %v3019_v12 = vpop.f32.mrf.mxu0  ;;  %3679 = vmatmul.msk.f32.gmra.mxu1 %vm223_vm1, %v4481_v62 }
 0x1d4   : > { %v4901_v2 = vadd.f32 %v1741_v63, %v1465_v25  ;;  %3745 = vmatmul.msk.f32.gmra.mxu2 %vm223_vm1, %v3711_v60 }
 0x1d5   : > { %3811 = vmatmul.msk.f32.gmra.mxu3 %vm223_vm1, %v4484_v10  ;;  %v5210_v10 = vld [vmem:[#allocation32_spill] sm:$0xff] }
 0x1d6   : > { %3877 = vmatmul.msk.f32.gmra.mxu0 %vm223_vm1, %v4515_v3 }
 0x1d7   : > { %v2335_v52 = vpop.f32.mrf.mxu2 }
 0x1d8   : > { %v2463_v17 = vadd.f32 %v2335_v52, %v2118_v51  ;;  %v2677_v41 = vpop.f32.mrf.mxu3  ;;  %v1993_v11 = vpop.f32.mrf.mxu1 }
 0x1d9   : > { %v2119_v0 = vadd.f32 %v1993_v11, %v5210_v10 }
 0x1da   : > { %v2805_v21 = vadd.f32 %v2677_v41, %v2463_v17  ;;  %v3714_v41 = vld [vmem:[%s4010_s26 + $0x110] sm:$0xff] }
 0x1db   : > { %v3022_v63 = vpop.f32.mrf.mxu0  ;;  %3680 = vmatmul.msk.f32.gmra.mxu1 %vm223_vm1, %v4498_v61 }
 0x1dc   : > { %v3147_v62 = vadd.f32 %v3019_v12, %v2805_v21  ;;  %3746 = vmatmul.msk.f32.gmra.mxu2 %vm223_vm1, %v3712_v56 }
 0x1dd   : > { %3812 = vmatmul.msk.f32.gmra.mxu3 %vm223_vm1, %v4501_v46  ;;  %v5211_v46 = vld [vmem:[#allocation33_spill] sm:$0xff] }
 0x1de   : > { %3878 = vmatmul.msk.f32.gmra.mxu0 %vm223_vm1, %v4532_v13  ;;  %3243 = vst [vmem:[%s4916_s14] sm:$0xff] %v3147_v62 }
 0x1df   : > { %v2338_v31 = vpop.f32.mrf.mxu2 }
 0x1e0   : > { %v2464_v35 = vadd.f32 %v2338_v31, %v2119_v0  ;;  %v2680_v43 = vpop.f32.mrf.mxu3  ;;  %v1996_v47 = vpop.f32.mrf.mxu1  ;;  %v3715_v31 = vld [vmem:[%s4010_s26 + $0x120] sm:$0xff] }
 0x1e1   : > { %v2120_v12 = vadd.f32 %v1996_v47, %v5211_v46  ;;  %v3716_v46 = vld [vmem:[%s4010_s26 + $0x128] sm:$0xff] }
 0x1e2   : > { %v2806_v60 = vadd.f32 %v2680_v43, %v2464_v35 }
 0x1e3   : > { %v3025_v61 = vpop.f32.mrf.mxu0  ;;  %3681 = vmatmul.msk.f32.gmra.mxu1 %vm223_vm1, %v4515_v3 }
 0x1e4   : > { %v3148_v25 = vadd.f32 %v3022_v63, %v2806_v60  ;;  %3747 = vmatmul.msk.f32.gmra.mxu2 %vm223_vm1, %v3713_v42 }
 0x1e5   : > { %3813 = vmatmul.msk.f32.gmra.mxu3 %vm223_vm1, %v4518_v4  ;;  %v5212_v4 = vld [vmem:[#allocation34_spill] sm:$0xff] }
 0x1e6   : > { %3879 = vmatmul.msk.f32.gmra.mxu0 %vm223_vm1, %v4549_v27  ;;  %3244 = vst [vmem:[%s4916_s14 + $0x8] sm:$0xff] %v3148_v25 }
 0x1e7   : > { %v2341_v28 = vpop.f32.mrf.mxu2 }
 0x1e8   : > { %v2465_v51 = vadd.f32 %v2341_v28, %v2120_v12  ;;  %v2683_v52 = vpop.f32.mrf.mxu3  ;;  %v1999_v17 = vpop.f32.mrf.mxu1 }
 0x1e9   : > { %v2121_v21 = vadd.f32 %v1999_v17, %v5212_v4 }
 0x1ea   : > { %v2807_v11 = vadd.f32 %v2683_v52, %v2465_v51 }
 0x1eb   : > { %v3028_v3 = vpop.f32.mrf.mxu0  ;;  %3682 = vmatmul.msk.f32.gmra.mxu1 %vm223_vm1, %v4532_v13 }
 0x1ec   : > { %v3149_v56 = vadd.f32 %v3025_v61, %v2807_v11  ;;  %3748 = vmatmul.msk.f32.gmra.mxu2 %vm223_vm1, %v3714_v41 }
 0x1ed   : > { %3814 = vmatmul.msk.f32.gmra.mxu3 %vm223_vm1, %v4535_v33  ;;  %v5213_v33 = vld [vmem:[#allocation35_spill] sm:$0xff] }
 0x1ee   : > { %3880 = vmatmul.msk.f32.gmra.mxu0 %vm223_vm1, %v4566_v44  ;;  %3245 = vst [vmem:[%s4916_s14 + $0x10] sm:$0xff] %v3149_v56 }
 0x1ef   : > { %v2344_v63 = vpop.f32.mrf.mxu2 }
 0x1f0   : > { %v2466_v62 = vadd.f32 %v2344_v63, %v2121_v21  ;;  %v2686_v10 = vpop.f32.mrf.mxu3  ;;  %v2002_v0 = vpop.f32.mrf.mxu1 }
 0x1f1   : > { %v2122_v47 = vadd.f32 %v2002_v0, %v5213_v33 }
 0x1f2   : > { %v2808_v35 = vadd.f32 %v2686_v10, %v2466_v62 }
 0x1f3   : > { %v3031_v13 = vpop.f32.mrf.mxu0  ;;  %3683 = vmatmul.msk.f32.gmra.mxu1 %vm223_vm1, %v4549_v27 }
 0x1f4   : > { %v3150_v43 = vadd.f32 %v3028_v3, %v2808_v35  ;;  %3749 = vmatmul.msk.f32.gmra.mxu2 %vm223_vm1, %v3715_v31  ;;  %v3717_v3 = vld [vmem:[%s4010_s26 + $0x138] sm:$0xff]  ;;  %v3718_v31 = vld [vmem:[%s4010_s26 + $0x140] sm:$0xff] }
 0x1f5   : > { %3815 = vmatmul.msk.f32.gmra.mxu3 %vm223_vm1, %v4552_v58  ;;  %v5214_v58 = vld [vmem:[#allocation36_spill] sm:$0xff] }
 0x1f6   : > { %3881 = vmatmul.msk.f32.gmra.mxu0 %vm223_vm1, %v4583_v8  ;;  %3246 = vst [vmem:[%s4916_s14 + $0x18] sm:$0xff] %v3150_v43 }
 0x1f7   : > { %v2347_v42 = vpop.f32.mrf.mxu2 }
 0x1f8   : > { %v2467_v60 = vadd.f32 %v2347_v42, %v2122_v47  ;;  %v2689_v61 = vpop.f32.mrf.mxu3  ;;  %v2005_v25 = vpop.f32.mrf.mxu1 }
 0x1f9   : > { %v2123_v51 = vadd.f32 %v2005_v25, %v5214_v58 }
 0x1fa   : > { %v2809_v12 = vadd.f32 %v2689_v61, %v2467_v60  ;;  %v3719_v61 = vld [vmem:[%s4010_s26 + $0x150] sm:$0xff] }
 0x1fb   : > { %v3034_v27 = vpop.f32.mrf.mxu0  ;;  %3684 = vmatmul.msk.f32.gmra.mxu1 %vm223_vm1, %v4566_v44 }
 0x1fc   : > { %v3151_v28 = vadd.f32 %v3031_v13, %v2809_v12  ;;  %3750 = vmatmul.msk.f32.gmra.mxu2 %vm223_vm1, %v3716_v46 }
 0x1fd   : > { %3816 = vmatmul.msk.f32.gmra.mxu3 %vm223_vm1, %v4569_v26  ;;  %v5215_v26 = vld [vmem:[#allocation37_spill] sm:$0xff] }
 0x1fe   : > { %3882 = vmatmul.msk.f32.gmra.mxu0 %vm223_vm1, %v4600_v32  ;;  %3247 = vst [vmem:[%s4916_s14 + $0x20] sm:$0xff] %v3151_v28 }
 0x1ff   : > { %v2350_v52 = vpop.f32.mrf.mxu2 }
 0x200   : > { %v2468_v17 = vadd.f32 %v2350_v52, %v2123_v51  ;;  %v2692_v41 = vpop.f32.mrf.mxu3  ;;  %v2008_v11 = vpop.f32.mrf.mxu1  ;;  %v3720_v52 = vld [vmem:[%s4010_s26 + $0x158] sm:$0xff] }
 0x201   : > { %v2124_v21 = vadd.f32 %v2008_v11, %v5215_v26  ;;  %v3721_v26 = vld [vmem:[%s4010_s26 + $0x168] sm:$0xff] }
 0x202   : > { %v2810_v56 = vadd.f32 %v2692_v41, %v2468_v17 }
 0x203   : > { %v3037_v44 = vpop.f32.mrf.mxu0  ;;  %3685 = vmatmul.msk.f32.gmra.mxu1 %vm223_vm1, %v4583_v8 }
 0x204   : > { %v3152_v4 = vadd.f32 %v3034_v27, %v2810_v56  ;;  %3751 = vmatmul.msk.f32.gmra.mxu2 %vm223_vm1, %v3717_v3 }
 0x205   : > { %3817 = vmatmul.msk.f32.gmra.mxu3 %vm223_vm1, %v4586_v6  ;;  %v5216_v6 = vld [vmem:[#allocation38_spill] sm:$0xff] }
 0x206   : > { %3883 = vmatmul.msk.f32.gmra.mxu0 %vm223_vm1, %v4617_v45  ;;  %3248 = vst [vmem:[%s4916_s14 + $0x28] sm:$0xff] %v3152_v4 }
 0x207   : > { %v2353_v63 = vpop.f32.mrf.mxu2 }
 0x208   : > { %v2469_v62 = vadd.f32 %v2353_v63, %v2124_v21  ;;  %v2695_v10 = vpop.f32.mrf.mxu3  ;;  %v2011_v0 = vpop.f32.mrf.mxu1 }
 0x209   : > { %v2125_v43 = vadd.f32 %v2011_v0, %v5216_v6  ;;  %v3722_v6 = vld [vmem:[%s4010_s26 + $0x170] sm:$0xff] }
 0x20a   : > { %v2811_v35 = vadd.f32 %v2695_v10, %v2469_v62  ;;  %v5220_v62 = vld [vmem:[#allocation45_spill] sm:$0xff] }
 0x20b   : > { %v3040_v8 = vpop.f32.mrf.mxu0  ;;  %3686 = vmatmul.msk.f32.gmra.mxu1 %vm223_vm1, %v4600_v32  ;;  %v5221_v10 = vld [vmem:[#allocation41_spill] sm:$0xff] }
 0x20c   : > { %v3153_v13 = vadd.f32 %v3037_v44, %v2811_v35  ;;  %3752 = vmatmul.msk.f32.gmra.mxu2 %vm223_vm1, %v3718_v31 }
 0x20d   : > { %3818 = vmatmul.msk.f32.gmra.mxu3 %vm223_vm1, %v4603_v16  ;;  %v5217_v16 = vld [vmem:[#allocation39_spill] sm:$0xff] }
 0x20e   : > { %3884 = vmatmul.msk.f32.gmra.mxu0 %vm223_vm1, %v4634_v59  ;;  %3249 = vst [vmem:[%s4916_s14 + $0x30] sm:$0xff] %v3153_v13 }
 0x20f   : > { %v2356_v33 = vpop.f32.mrf.mxu2 }
 0x210   : > { %v2470_v47 = vadd.f32 %v2356_v33, %v2125_v43  ;;  %v2698_v42 = vpop.f32.mrf.mxu3  ;;  %v2014_v60 = vpop.f32.mrf.mxu1 }
 0x211   : > { %v2126_v12 = vadd.f32 %v2014_v60, %v5217_v16 }
 0x212   : > { %v2812_v25 = vadd.f32 %v2698_v42, %v2470_v47  ;;  %v5222_v47 = vld [vmem:[#allocation43_spill] sm:$0xff] }
 0x213   : > { %v3043_v32 = vpop.f32.mrf.mxu0  ;;  %3687 = vmatmul.msk.f32.gmra.mxu1 %vm223_vm1, %v4617_v45 }
 0x214   : > { %v3154_v46 = vadd.f32 %v3040_v8, %v2812_v25  ;;  %3753 = vmatmul.msk.f32.gmra.mxu2 %vm223_vm1, %v3719_v61 }
 0x215   : > { %3819 = vmatmul.msk.f32.gmra.mxu3 %vm223_vm1, %v4620_v14  ;;  %v5218_v14 = vld [vmem:[#allocation40_spill] sm:$0xff] }
 0x216   : > { %3885 = vmatmul.msk.f32.gmra.mxu0 %vm223_vm1, %v4651_v1  ;;  %3250 = vst [vmem:[%s4916_s14 + $0x38] sm:$0xff] %v3154_v46 }
 0x217   : > { %v2359_v27 = vpop.f32.mrf.mxu2 }
 0x218   : > { %v2471_v28 = vadd.f32 %v2359_v27, %v2126_v12  ;;  %v2701_v58 = vpop.f32.mrf.mxu3  ;;  %v2017_v51 = vpop.f32.mrf.mxu1 }
 0x219   : > { %v2127_v11 = vadd.f32 %v2017_v51, %v5218_v14 }
 0x21a   : > { %v2813_v17 = vadd.f32 %v2701_v58, %v2471_v28 }
 0x21b   : > { %v3046_v45 = vpop.f32.mrf.mxu0  ;;  %3688 = vmatmul.msk.f32.gmra.mxu1 %vm223_vm1, %v4634_v59 }
 0x21c   : > { %v3155_v41 = vadd.f32 %v3043_v32, %v2813_v17  ;;  %3754 = vmatmul.msk.f32.gmra.mxu2 %vm223_vm1, %v3720_v52 }
 0x21d   : > { %3820 = vmatmul.msk.f32.gmra.mxu3 %vm223_vm1, %v4637_v18  ;;  %v5219_v18 = vld [vmem:[#allocation42_spill] sm:$0xff] }
 0x21e   : > { %3886 = vmatmul.msk.f32.gmra.mxu0 %vm223_vm1, %v4668_v9  ;;  %3251 = vst [vmem:[%s4916_s14 + $0x40] sm:$0xff] %v3155_v41  ;;  %v3856_v41 = vld [vmem:[%s4010_s26 + $0x18a] sm:$0xff] }
 0x21f   : > { %v2362_v3 = vpop.f32.mrf.mxu2 }
 0x220   : > { %v2472_v56 = vadd.f32 %v2362_v3, %v2127_v11  ;;  %v2704_v44 = vpop.f32.mrf.mxu3  ;;  %v2020_v4 = vpop.f32.mrf.mxu1 }
 0x221   : > { %v2128_v0 = vadd.f32 %v2020_v4, %v5221_v10  ;;  %v3725_v4 = vld [vmem:[%s4010_s26 + $0x198] sm:$0xff] }
 0x222   : > { %v2814_v21 = vadd.f32 %v2704_v44, %v2472_v56 }
 0x223   : > { %v3049_v59 = vpop.f32.mrf.mxu0  ;;  %3689 = vmatmul.msk.f32.gmra.mxu1 %vm223_vm1, %v4651_v1 }
 0x224   : > { %v3156_v63 = vadd.f32 %v3046_v45, %v2814_v21  ;;  %3755 = vmatmul.msk.f32.gmra.mxu2 %vm223_vm1, %v3721_v26 }
 0x225   : > { %3821 = vmatmul.msk.f32.gmra.mxu3 %vm223_vm1, %v5219_v18 }
 0x226   : > { %3887 = vmatmul.msk.f32.gmra.mxu0 %vm223_vm1, %v5220_v62  ;;  %3252 = vst [vmem:[%s4916_s14 + $0x48] sm:$0xff] %v3156_v63 }
 0x227   : > { %v2365_v31 = vpop.f32.mrf.mxu2 }
 0x228   : > { %v2473_v35 = vadd.f32 %v2365_v31, %v2128_v0  ;;  %v2707_v8 = vpop.f32.mrf.mxu3  ;;  %v2023_v13 = vpop.f32.mrf.mxu1  ;;  %v3726_v0 = vld [vmem:[%s4010_s26 + $0x1a0] sm:$0xff] }
 0x229   : > { %v2129_v42 = vadd.f32 %v2023_v13, %v5222_v47  ;;  %v3858_v13 = vld [vmem:[%s4010_s26 + $0x1a2] sm:$0xff] }
 0x22a   : > { %v2815_v43 = vadd.f32 %v2707_v8, %v2473_v35  ;;  %v3792_v35 = vld [vmem:[%s4010_s26 + $0x1a1] sm:$0xff] }
 0x22b   : > { %v3052_v1 = vpop.f32.mrf.mxu0  ;;  %3690 = vmatmul.msk.f32.gmra.mxu1 %vm223_vm1, %v4668_v9  ;;  %v3855_v9 = vld [vmem:[%s4010_s26 + $0x182] sm:$0xff] }
 0x22c   : > { %v3157_v33 = vadd.f32 %v3049_v59, %v2815_v43  ;;  %3756 = vmatmul.msk.f32.gmra.mxu2 %vm223_vm1, %v3722_v6 }
 0x22d   : > { %3822 = vmatmul.msk.f32.gmra.mxu3 %vm223_vm1, %v4671_v29  ;;  %v5223_v29 = vld [vmem:[#allocation44_spill] sm:$0xff] }
 0x22e   : > { %3888 = vmatmul.msk.f32.gmra.mxu0 %vm223_vm1, %v4705_v19  ;;  %3253 = vst [vmem:[%s4916_s14 + $0x50] sm:$0xff] %v3157_v33 }
 0x22f   : > { %v2368_v60 = vpop.f32.mrf.mxu2 }
 0x230   : > { %v2474_v61 = vadd.f32 %v2368_v60, %v2129_v42  ;;  %v2710_v25 = vpop.f32.mrf.mxu3  ;;  %v2026_v32 = vpop.f32.mrf.mxu1 }
 0x231   : > { %v2130_v27 = vadd.f32 %v2026_v32, %v5223_v29 }
 0x232   : > { %v2816_v46 = vadd.f32 %v2710_v25, %v2474_v61 }
 0x233   : > { %v3055_v16 = vpop.f32.mrf.mxu0  ;;  %3691 = vmatmul.msk.f32.gmra.mxu1 %vm223_vm1, %v5220_v62 }
 0x234   : > { %v3158_v12 = vadd.f32 %v3052_v1, %v2816_v46  ;;  %3757 = vmatmul.msk.f32.gmra.mxu2 %vm223_vm1, %v4688_v23 }
 0x235   : > { %3823 = vmatmul.msk.f32.gmra.mxu3 %vm223_vm1, %v4691_v37  ;;  %v5224_v37 = vld [vmem:[#allocation46_spill] sm:$0xff] }
 0x236   : > { %3889 = vmatmul.msk.f32.gmra.mxu0 %vm223_vm1, %v3855_v9  ;;  %3254 = vst [vmem:[%s4916_s14 + $0x58] sm:$0xff] %v3158_v12 }
 0x237   : > { %v2371_v28 = vpop.f32.mrf.mxu2 }
 0x238   : > { %v2475_v58 = vadd.f32 %v2371_v28, %v2130_v27  ;;  %v2713_v51 = vpop.f32.mrf.mxu3  ;;  %v2029_v52 = vpop.f32.mrf.mxu1 }
 0x239   : > { %v2131_v14 = vadd.f32 %v2029_v52, %v5224_v37 }
 0x23a   : > { %v2817_v17 = vadd.f32 %v2713_v51, %v2475_v58 }
 0x23b   : > { %v3058_v45 = vpop.f32.mrf.mxu0  ;;  %3692 = vmatmul.msk.f32.gmra.mxu1 %vm223_vm1, %v4705_v19  ;;  %v3791_v19 = vld [vmem:[%s4010_s26 + $0x199] sm:$0xff] }
 0x23c   : > { %v3159_v23 = vadd.f32 %v3055_v16, %v2817_v17  ;;  %3758 = vmatmul.msk.f32.gmra.mxu2 %vm223_vm1, %v4708_v38  ;;  %v3857_v38 = vld [vmem:[%s4010_s26 + $0x19a] sm:$0xff] }
 0x23d   : > { %3824 = vmatmul.msk.f32.gmra.mxu3 %vm223_vm1, %v4711_v22 }
 0x23e   : > { %3890 = vmatmul.msk.f32.gmra.mxu0 %vm223_vm1, %v3856_v41  ;;  %3255 = vst [vmem:[%s4916_s14 + $0x60] sm:$0xff] %v3159_v23 }
 0x23f   : > { %v2374_v11 = vpop.f32.mrf.mxu2 }
 0x240   : > { %v2476_v3 = vadd.f32 %v2374_v11, %v2131_v14  ;;  %v2716_v56 = vpop.f32.mrf.mxu3  ;;  %v2032_v44 = vpop.f32.mrf.mxu1 }
 0x241   : > { %v2132_v22 = vadd.f32 %v2032_v44, %v4713_v15 }
 0x242   : > { %v2818_v26 = vadd.f32 %v2716_v56, %v2476_v3 }
 0x243   : > { %v3061_v21 = vpop.f32.mrf.mxu0  ;;  %3693 = vmatmul.msk.f32.gmra.mxu1 %vm223_vm1, %v3855_v9 }
 0x244   : > { %v3160_v59 = vadd.f32 %v3058_v45, %v2818_v26  ;;  %3759 = vmatmul.msk.f32.gmra.mxu2 %vm223_vm1, %v3725_v4 }
 0x245   : > { %3825 = vmatmul.msk.f32.gmra.mxu3 %vm223_vm1, %v3791_v19 }
 0x246   : > { %3891 = vmatmul.msk.f32.gmra.mxu0 %vm223_vm1, %v3857_v38  ;;  %3256 = vst [vmem:[%s4916_s14 + $0x68] sm:$0xff] %v3160_v59 }
 0x247   : > { %v2377_v63 = vpop.f32.mrf.mxu2 }
 0x248   : > { %v2477_v18 = vadd.f32 %v2377_v63, %v2132_v22  ;;  %v2719_v62 = vpop.f32.mrf.mxu3  ;;  %v2035_v10 = vpop.f32.mrf.mxu1 }
 0x249   : > { %v2133_v15 = vadd.f32 %v2035_v10, %v4724_v30 }
 0x24a   : > { %v2819_v31 = vadd.f32 %v2719_v62, %v2477_v18 }
 0x24b   : > { %v3064_v8 = vpop.f32.mrf.mxu0  ;;  %3694 = vmatmul.msk.f32.gmra.mxu1 %vm223_vm1, %v3856_v41 }
 0x24c   : > { %v3161_v6 = vadd.f32 %v3061_v21, %v2819_v31  ;;  %3760 = vmatmul.msk.f32.gmra.mxu2 %vm223_vm1, %v3726_v0 }
 0x24d   : > { %3826 = vmatmul.msk.f32.gmra.mxu3 %vm223_vm1, %v3792_v35 }
 0x24e   : > { %3892 = vmatmul.msk.f32.gmra.mxu0 %vm223_vm1, %v3858_v13  ;;  %3257 = vst [vmem:[%s4916_s14 + $0x70] sm:$0xff] %v3161_v6 }
 0x24f   : > { %v2380_v43 = vpop.f32.mrf.mxu2 }
 0x250   : > { %v2478_v1 = vadd.f32 %v2380_v43, %v2133_v15  ;;  %v2722_v33 = vpop.f32.mrf.mxu3  ;;  %v2038_v47 = vpop.f32.mrf.mxu1 }
 0x251   : > { %v2134_v25 = vadd.f32 %v2038_v47, %v4735_v34 }
 0x252   : > { %v2820_v42 = vadd.f32 %v2722_v33, %v2478_v1 }
 0x253   : > { %v3067_v60 = vpop.f32.mrf.mxu0 }
 0x254   : > { %v3162_v61 = vadd.f32 %v3064_v8, %v2820_v42 }
 0x256   : > { %3258 = vst [vmem:[%s4916_s14 + $0x78] sm:$0xff] %v3162_v61 }
 0x257   : > { %v2383_v32 = vpop.f32.mrf.mxu2 }
 0x258   : > { %v2479_v46 = vadd.f32 %v2383_v32, %v2134_v25  ;;  %v2725_v16 = vpop.f32.mrf.mxu3  ;;  %v2041_v9 = vpop.f32.mrf.mxu1 }
 0x259   : > { %v2135_v27 = vadd.f32 %v2041_v9, %v4746_v7 }
 0x25a   : > { %v2821_v12 = vadd.f32 %v2725_v16, %v2479_v46 }
 0x25b   : > { %v3070_v29 = vpop.f32.mrf.mxu0 }
 0x25c   : > { %v3163_v30 = vadd.f32 %v3067_v60, %v2821_v12 }
 0x25e   : > { %3259 = vst [vmem:[%s4916_s14 + $0x80] sm:$0xff] %v3163_v30 }
 0x25f   : > { %v2386_v28 = vpop.f32.mrf.mxu2 }
 0x260   : > { %v2480_v58 = vadd.f32 %v2386_v28, %v2135_v27  ;;  %v2728_v51 = vpop.f32.mrf.mxu3  ;;  %v2044_v52 = vpop.f32.mrf.mxu1 }
 0x261   : > { %v2136_v41 = vadd.f32 %v2044_v52, %v4757_v39 }
 0x262   : > { %v2822_v17 = vadd.f32 %v2728_v51, %v2480_v58 }
 0x263   : > { %v3073_v45 = vpop.f32.mrf.mxu0 }
 0x264   : > { %v3164_v34 = vadd.f32 %v3070_v29, %v2822_v17 }
 0x266   : > { %3260 = vst [vmem:[%s4916_s14 + $0x88] sm:$0xff] %v3164_v34 }
 0x267   : > { %v2389_v23 = vpop.f32.mrf.mxu2 }
 0x268   : > { %v2481_v37 = vadd.f32 %v2389_v23, %v2136_v41  ;;  %v2731_v14 = vpop.f32.mrf.mxu3  ;;  %v2047_v11 = vpop.f32.mrf.mxu1 }
 0x269   : > { %v2137_v44 = vadd.f32 %v2047_v11, %v4769_v53 }
 0x26a   : > { %v2823_v3 = vadd.f32 %v2731_v14, %v2481_v37 }
 0x26b   : > { %v3076_v56 = vpop.f32.mrf.mxu0 }
 0x26c   : > { %v3165_v7 = vadd.f32 %v3073_v45, %v2823_v3 }
 0x26e   : > { %3261 = vst [vmem:[%s4916_s14 + $0x90] sm:$0xff] %v3165_v7 }
 0x26f   : > { %v2392_v4 = vpop.f32.mrf.mxu2 }
 0x270   : > { %v2482_v26 = vadd.f32 %v2392_v4, %v2137_v44  ;;  %v2734_v19 = vpop.f32.mrf.mxu3  ;;  %v2050_v21 = vpop.f32.mrf.mxu1 }
 0x271   : > { %v2138_v22 = vadd.f32 %v2050_v21, %v4780_v50 }
 0x272   : > { %v2824_v38 = vadd.f32 %v2734_v19, %v2482_v26 }
 0x273   : > { %v3079_v59 = vpop.f32.mrf.mxu0 }
 0x274   : > { %v3166_v39 = vadd.f32 %v3076_v56, %v2824_v38 }
 0x276   : > { %3262 = vst [vmem:[%s4916_s14 + $0x98] sm:$0xff] %v3166_v39 }
 0x277   : > { %v2395_v63 = vpop.f32.mrf.mxu2 }
 0x278   : > { %v2483_v18 = vadd.f32 %v2395_v63, %v2138_v22  ;;  %v2737_v62 = vpop.f32.mrf.mxu3  ;;  %v2053_v10 = vpop.f32.mrf.mxu1 }
 0x279   : > { %v2139_v35 = vadd.f32 %v2053_v10, %v4791_v24 }
 0x27a   : > { %v2825_v0 = vadd.f32 %v2737_v62, %v2483_v18 }
 0x27b   : > { %v3082_v31 = vpop.f32.mrf.mxu0 }
 0x27c   : > { %v3167_v53 = vadd.f32 %v3079_v59, %v2825_v0 }
 0x27e   : > { %3263 = vst [vmem:[%s4916_s14 + $0xa0] sm:$0xff] %v3167_v53 }
 0x27f   : > { %v2398_v8 = vpop.f32.mrf.mxu2 }
 0x280   : > { %v2484_v13 = vadd.f32 %v2398_v8, %v2139_v35  ;;  %v2740_v6 = vpop.f32.mrf.mxu3  ;;  %v2056_v15 = vpop.f32.mrf.mxu1 }
 0x281   : > { %v2140_v33 = vadd.f32 %v2056_v15, %v4802_v49 }
 0x282   : > { %v2826_v43 = vadd.f32 %v2740_v6, %v2484_v13 }
 0x283   : > { %v3085_v1 = vpop.f32.mrf.mxu0 }
 0x284   : > { %v3168_v50 = vadd.f32 %v3082_v31, %v2826_v43 }
 0x286   : > { %3264 = vst [vmem:[%s4916_s14 + $0xa8] sm:$0xff] %v3168_v50 }
 0x287   : > { %v2401_v47 = vpop.f32.mrf.mxu2 }
 0x288   : > { %v2485_v42 = vadd.f32 %v2401_v47, %v2140_v33  ;;  %v2743_v60 = vpop.f32.mrf.mxu3  ;;  %v2059_v61 = vpop.f32.mrf.mxu1 }
 0x289   : > { %v2141_v46 = vadd.f32 %v2059_v61, %v4813_v57 }
 0x28a   : > { %v2827_v25 = vadd.f32 %v2743_v60, %v2485_v42 }
 0x28b   : > { %v3088_v32 = vpop.f32.mrf.mxu0 }
 0x28c   : > { %v3169_v24 = vadd.f32 %v3085_v1, %v2827_v25 }
 0x28e   : > { %3265 = vst [vmem:[%s4916_s14 + $0xb0] sm:$0xff] %v3169_v24 }
 0x28f   : > { %v2404_v16 = vpop.f32.mrf.mxu2 }
 0x290   : > { %v2486_v9 = vadd.f32 %v2404_v16, %v2141_v46  ;;  %v2746_v12 = vpop.f32.mrf.mxu3  ;;  %v2062_v29 = vpop.f32.mrf.mxu1 }
 0x291   : > { %v2142_v28 = vadd.f32 %v2062_v29, %v4824_v5 }
 0x292   : > { %v2828_v30 = vadd.f32 %v2746_v12, %v2486_v9 }
 0x293   : > { %v3091_v27 = vpop.f32.mrf.mxu0 }
 0x294   : > { %v3170_v49 = vadd.f32 %v3088_v32, %v2828_v30 }
 0x296   : > { %3266 = vst [vmem:[%s4916_s14 + $0xb8] sm:$0xff] %v3170_v49 }
 0x297   : > { %v2407_v58 = vpop.f32.mrf.mxu2 }
 0x298   : > { %v2487_v51 = vadd.f32 %v2407_v58, %v2142_v28  ;;  %v2749_v52 = vpop.f32.mrf.mxu3  ;;  %v2065_v17 = vpop.f32.mrf.mxu1 }
 0x299   : > { %v2143_v41 = vadd.f32 %v2065_v17, %v4835_v54 }
 0x29a   : > { %v2829_v45 = vadd.f32 %v2749_v52, %v2487_v51 }
 0x29b   : > { %v3094_v34 = vpop.f32.mrf.mxu0 }
 0x29c   : > { %v3171_v57 = vadd.f32 %v3091_v27, %v2829_v45 }
 0x29e   : > { %3267 = vst [vmem:[%s4916_s14 + $0xc0] sm:$0xff] %v3171_v57 }
 0x29f   : > { %v2410_v23 = vpop.f32.mrf.mxu2 }
 0x2a0   : > { %v2488_v37 = vadd.f32 %v2410_v23, %v2143_v41  ;;  %v2752_v14 = vpop.f32.mrf.mxu3  ;;  %v2068_v11 = vpop.f32.mrf.mxu1 }
 0x2a1   : > { %v2144_v7 = vadd.f32 %v2068_v11, %v4846_v36 }
 0x2a2   : > { %v2830_v3 = vadd.f32 %v2752_v14, %v2488_v37 }
 0x2a3   : > { %v3097_v56 = vpop.f32.mrf.mxu0 }
 0x2a4   : > { %v3172_v5 = vadd.f32 %v3094_v34, %v2830_v3 }
 0x2a6   : > { %3268 = vst [vmem:[%s4916_s14 + $0xc8] sm:$0xff] %v3172_v5 }
 0x2a7   : > { %v2413_v44 = vpop.f32.mrf.mxu2 }
 0x2a8   : > { %v2489_v4 = vadd.f32 %v2413_v44, %v2144_v7  ;;  %v2755_v26 = vpop.f32.mrf.mxu3  ;;  %v2071_v19 = vpop.f32.mrf.mxu1 }
 0x2a9   : > { %v2145_v59 = vadd.f32 %v2071_v19, %v4857_v20 }
 0x2aa   : > { %v2831_v21 = vadd.f32 %v2755_v26, %v2489_v4 }
 0x2ab   : > { %v3100_v38 = vpop.f32.mrf.mxu0 }
 0x2ac   : > { %v3173_v54 = vadd.f32 %v3097_v56, %v2831_v21 }
 0x2ae   : > { %3269 = vst [vmem:[%s4916_s14 + $0xd0] sm:$0xff] %v3173_v54 }
 0x2af   : > { %v2416_v39 = vpop.f32.mrf.mxu2 }
 0x2b0   : > { %v2490_v22 = vadd.f32 %v2416_v39, %v2145_v59  ;;  %v2758_v63 = vpop.f32.mrf.mxu3  ;;  %v2074_v18 = vpop.f32.mrf.mxu1 }
 0x2b1   : > { %v2146_v0 = vadd.f32 %v2074_v18, %v4868_v55 }
 0x2b2   : > { %v2832_v62 = vadd.f32 %v2758_v63, %v2490_v22 }
 0x2b3   : > { %v3103_v10 = vpop.f32.mrf.mxu0 }
 0x2b4   : > { %v3174_v36 = vadd.f32 %v3100_v38, %v2832_v62 }
 0x2b6   : > { %3270 = vst [vmem:[%s4916_s14 + $0xd8] sm:$0xff] %v3174_v36 }
 0x2b7   : > { %v2419_v31 = vpop.f32.mrf.mxu2 }
 0x2b8   : > { %v2491_v53 = vadd.f32 %v2419_v31, %v2146_v0  ;;  %v2761_v35 = vpop.f32.mrf.mxu3  ;;  %v2077_v8 = vpop.f32.mrf.mxu1 }
 0x2b9   : > { %v2147_v15 = vadd.f32 %v2077_v8, %v4879_v48 }
 0x2ba   : > { %v2833_v13 = vadd.f32 %v2761_v35, %v2491_v53 }
 0x2bb   : > { %v3106_v20 = vpop.f32.mrf.mxu0 }
 0x2bc   : > { %v3175_v6 = vadd.f32 %v3103_v10, %v2833_v13 }
 0x2be   : > { %3271 = vst [vmem:[%s4916_s14 + $0xe0] sm:$0xff] %v3175_v6 }
 0x2bf   : > { %v2422_v43 = vpop.f32.mrf.mxu2 }
 0x2c0   : > { %v2492_v1 = vadd.f32 %v2422_v43, %v2147_v15  ;;  %v2764_v50 = vpop.f32.mrf.mxu3  ;;  %v2080_v33 = vpop.f32.mrf.mxu1 }
 0x2c1   : > { %v2148_v55 = vadd.f32 %v2080_v33, %v4890_v40 }
 0x2c2   : > { %v2834_v47 = vadd.f32 %v2764_v50, %v2492_v1 }
 0x2c3   : > { %v3109_v61 = vpop.f32.mrf.mxu0 }
 0x2c4   : > { %v3176_v42 = vadd.f32 %v3106_v20, %v2834_v47 }
 0x2c6   : > { %3272 = vst [vmem:[%s4916_s14 + $0xe8] sm:$0xff] %v3176_v42 }
 0x2c7   : > { %v2425_v60 = vpop.f32.mrf.mxu2 }
 0x2c8   : > { %v2493_v25 = vadd.f32 %v2425_v60, %v2148_v55  ;;  %v2767_v32 = vpop.f32.mrf.mxu3  ;;  %v2083_v46 = vpop.f32.mrf.mxu1 }
 0x2c9   : > { %v2149_v48 = vadd.f32 %v2083_v46, %v4901_v2 }
 0x2ca   : > { %v2835_v24 = vadd.f32 %v2767_v32, %v2493_v25 }
 0x2cb   : > { %v3112_v30 = vpop.f32.mrf.mxu0 }
 0x2cc   : > { %v3177_v16 = vadd.f32 %v3109_v61, %v2835_v24 }
 0x2ce   : > { %3273 = vst [vmem:[%s4916_s14 + $0xf0] sm:$0xff] %v3177_v16 }
 0x2cf   : > { %v2428_v9 = vpop.f32.mrf.mxu2 }
 0x2d0   : > { %v2494_v12 = vadd.f32 %v2428_v9, %v2149_v48  ;;  %v2770_v29 = vpop.f32.mrf.mxu3 }
 0x2d2   : > { %v2836_v27 = vadd.f32 %v2770_v29, %v2494_v12 }
 0x2d4   : > { %v3178_v49 = vadd.f32 %v3112_v30, %v2836_v27 }
 0x2d6   : > { %3274 = vst [vmem:[%s4916_s14 + $0xf8] sm:$0xff] %v3178_v49 }
 0x2d7 PF: > { %s12_s11 = sadd.s32 1, %s3946_s11   ;;  %s5225_s9 = smov %s3942_s10 }
 0x2d8   : > { %p9_p5 = scmp.ge.s32.totalorder %s12_s11, 4   ;;  %s5226_s10 = smov %s5228_s12 }
 0x2da   :  { %11 = sbr.rel (!%p9_p5) target bundleno = 2 (0x2), region = 69 }

</bundles_post_ra>
